<compile_context>
chip_gen: v7x
topology: tpu7x:2x2x1
jax: 0.10.0
libtpu: 0.0.40
codegen_flags: <defaults>
</compile_context>

<pallas_src>
import jax
import jax.numpy as jnp
from jax.experimental import pallas as pl
from jax.experimental.pallas import tpu as pltpu

_HI = jax.lax.Precision.HIGHEST   # exact f32 path for the tiny dots


# ----------------------------- Pallas kernel --------------------------------
def _critic_kernel(e1_ref, e2_ref, r_ref, s_ref, w_kron_ref, wb1t_ref, wb2t_ref,
                   bias_ref, w1t_ref, w2t_ref, out_ref):
    e1 = e1_ref[...]                       # (TB, F)  f32
    e2 = e2_ref[...]                       # (TB, F)  f32
    T = w_kron_ref.shape[1]

    # Packed biases: [ ntn_bias (T) | fc1_b (16) | fc2_b (1) ]
    biases = bias_ref[...]                 # (1, T + 17)
    ntn_bias = biases[:, :T]               # (1, T)
    b1 = biases[:, T:T + 16]               # (1, 16)
    b2 = biases[:, T + 16:]                # (1, 1)

    # ---- TensorNetworkModule (SimGNN NTN) ----
    # Lane-dense kron via constant 0/1 gather matmuls (no narrow intermediate,
    # no tile-crossing reshape):
    #   e1_rep[b, i*F+j] = e1[b, i],  e2_til[b, i*F+j] = e2[b, j]
    e1_rep = jnp.dot(e1, r_ref[...], preferred_element_type=jnp.float32,
                     precision=_HI)                                              # (TB, F*F)
    e2_til = jnp.dot(e2, s_ref[...], preferred_element_type=jnp.float32,
                     precision=_HI)                                              # (TB, F*F)
    kron = e1_rep * e2_til                                                       # (TB, F*F)

    # Dominant contraction (K = F*F): single bf16 MXU pass, f32 accumulate.
    bilinear = jnp.dot(kron.astype(jnp.bfloat16), w_kron_ref[...],
                       preferred_element_type=jnp.float32)                      # (TB, T)

    # Block term: e1 @ Wb1.T + e2 @ Wb2.T  (two tiny K=F matmuls, no concat).
    block = (jnp.dot(e1, wb1t_ref[...], preferred_element_type=jnp.float32,
                     precision=_HI)
             + jnp.dot(e2, wb2t_ref[...], preferred_element_type=jnp.float32,
                       precision=_HI))                                           # (TB, T)

    ntn = jnp.maximum(bilinear + block + ntn_bias, 0.0)                          # (TB, T)

    # ---- scoring head: Linear(T,16) -> ReLU -> Linear(16,1) -> Tanh ----
    h = jnp.maximum(
        jnp.dot(ntn, w1t_ref[...], preferred_element_type=jnp.float32,
                precision=_HI) + b1, 0.0)                                        # (TB, 16)
    v = jnp.tanh(
        jnp.dot(h, w2t_ref[...], preferred_element_type=jnp.float32,
                precision=_HI) + b2)                                             # (TB, 1)

    out_ref[...] = v


# ------------------------ one-time weight preparation -------------------------
def prepare_critic_params(params):
    """Hoisted weight-layout prep: call once, reuse across all forward calls."""
    W = params["ntn_weight"]                         # (F, F, T)
    F, _, T = W.shape
    Wb = params["ntn_weight_block"]                  # (T, 2F)
    eye_f = jnp.eye(F, dtype=jnp.float32)
    bias = jnp.concatenate(
        [params["ntn_bias"].reshape(1, T),
         params["fc1_b"].reshape(1, 16),
         params["fc2_b"].reshape(1, 1)], axis=1)     # (1, T + 17)
    return {
        # Constant gather matrices for the lane-dense kron build.
        "r": jnp.kron(eye_f, jnp.ones((1, F), jnp.float32)),   # (F, F*F): R[i, i*F+j] = 1
        "s": jnp.kron(jnp.ones((1, F), jnp.float32), eye_f),   # (F, F*F): S[j, i*F+j] = 1
        # kron row [i*F+j] hits W[i, j, :]; stored bf16 (MXU-native, half the VMEM/DMA).
        "w_kron": W.reshape(F * F, T).astype(jnp.bfloat16),     # (F*F, T)
        "wb1t": Wb[:, :F].T,                                    # (F, T)
        "wb2t": Wb[:, F:].T,                                    # (F, T)
        "bias": bias,                                           # (1, T + 17)
        "w1t": params["fc1_w"].T,                               # (T, 16)
        "w2t": params["fc2_w"].T,                               # (16, 1)
    }


# ------------------------------ wrapper ---------------------------------------
def _round_up(x, m):
    return ((x + m - 1) // m) * m


@jax.jit
def critic_net_forward(prepared, global_feat_1, global_feat_2):
    B, F = global_feat_1.shape
    T = prepared["w_kron"].shape[1]

    # ---- batch tiling ----
    # Fat tiles (up to 256 rows) amortize the ~0.35us/grid-step fixed cost on
    # single-TC v5e/v6e; >=2 steps whenever possible so the "parallel" axis can
    # shard across both v7x TensorCores; TB ~ round_up(ceil(B/n_steps), 8)
    # minimizes padding waste on the last step.
    TB_CAP = 256
    B8 = _round_up(B, 8)
    if B8 <= 8:
        n_steps = 1
    else:
        n_steps = max(2, pl.cdiv(B8, TB_CAP))
    TB = _round_up(pl.cdiv(B8, n_steps), 8)
    n_steps = pl.cdiv(B8, TB)
    B_pad = TB * n_steps

    if B_pad != B:
        pad = ((0, B_pad - B), (0, 0))
        e1 = jnp.pad(global_feat_1, pad)
        e2 = jnp.pad(global_feat_2, pad)
    else:
        e1, e2 = global_feat_1, global_feat_2

    batch_spec = pl.BlockSpec((TB, F), lambda b: (b, 0))
    # Constant index_map -> weights stay resident in VMEM across grid steps.
    resident = lambda a: pl.BlockSpec(a.shape, lambda b: (0, 0))

    # Advisory cost estimate (helps XLA schedule this call inside the PPO graph).
    flops = int(
        2 * (2 * B_pad * F * F * F)            # two gather matmuls
        + B_pad * F * F                        # kron elementwise multiply
        + 2 * B_pad * (F * F) * T              # bilinear
        + 2 * (2 * B_pad * F * T)              # block
        + 2 * B_pad * T * 16 + 2 * B_pad * 16  # scoring head
    )
    weight_bytes = sum(int(prepared[k].size) * prepared[k].dtype.itemsize
                       for k in ("r", "s", "w_kron", "wb1t", "wb2t",
                                 "bias", "w1t", "w2t"))
    bytes_accessed = int(2 * B_pad * F * 4 + B_pad * 4 + weight_bytes)
    cost = pl.CostEstimate(flops=flops, transcendentals=int(B_pad),
                           bytes_accessed=bytes_accessed)

    out = pl.pallas_call(
        _critic_kernel,
        out_shape=jax.ShapeDtypeStruct((B_pad, 1), jnp.float32),
        grid=(n_steps,),
        in_specs=[batch_spec, batch_spec,
                  resident(prepared["r"]),
                  resident(prepared["s"]),
                  resident(prepared["w_kron"]),
                  resident(prepared["wb1t"]),
                  resident(prepared["wb2t"]),
                  resident(prepared["bias"]),
                  resident(prepared["w1t"]),
                  resident(prepared["w2t"])],
        out_specs=pl.BlockSpec((TB, 1), lambda b: (b, 0)),
        compiler_params=pltpu.CompilerParams(dimension_semantics=("parallel",)),
        cost_estimate=cost,
    )(e1, e2, prepared["r"], prepared["s"], prepared["w_kron"],
      prepared["wb1t"], prepared["wb2t"], prepared["bias"],
      prepared["w1t"], prepared["w2t"])
    return out[:B, 0]                                # .squeeze(-1)


# -------------------------- pure-JAX reference --------------------------------
def critic_net_reference(params, g1, g2):
    W = params["ntn_weight"]                         # (F, F, T)
    bilinear = jnp.einsum("bi,ijt,bj->bt", g1, W, g2, precision=_HI)
    comb = jnp.concatenate([g1, g2], axis=1)
    block = jnp.dot(comb, params["ntn_weight_block"].T, precision=_HI)
    ntn = jax.nn.relu(bilinear + block + params["ntn_bias"].reshape(-1))
    h = jax.nn.relu(jnp.dot(ntn, params["fc1_w"].T, precision=_HI) + params["fc1_b"])
    v = jnp.tanh(jnp.dot(h, params["fc2_w"].T, precision=_HI) + params["fc2_b"])
    return v[:, 0]


# -------------------------- deterministic params -------------------------------
def init_params(key, state_feature_size):
    F = state_feature_size
    T = F

    def xavier(k, shape, fan_in, fan_out):
        bound = (6.0 / (fan_in + fan_out)) ** 0.5
        return jax.random.uniform(k, shape, jnp.float32, -bound, bound)

    k = jax.random.split(key, 7)
    return {
        # TensorNetworkModule
        "ntn_weight":       xavier(k[0], (F, F, T), F * F, T),
        "ntn_weight_block": xavier(k[1], (T, 2 * F), 2 * F, T),
        "ntn_bias":         xavier(k[2], (T, 1), 1, T),
        # scoring_layer: Linear(F,16) -> ReLU -> Linear(16,1) -> Tanh
        "fc1_w": xavier(k[3], (16, F), F, 16),
        "fc1_b": jax.random.uniform(k[4], (16,), jnp.float32, -0.05, 0.05),
        "fc2_w": xavier(k[5], (1, 16), 16, 1),
        "fc2_b": jax.random.uniform(k[6], (1,), jnp.float32, -0.05, 0.05),
    }


if __name__ == "__main__":
    B = 2                    # batch
    F = 32                   # state_feature_size (== tensor_neurons)

    key = jax.random.PRNGKey(0)
    kp, k1, k2 = jax.random.split(key, 3)
    params = init_params(kp, F)
    global_feat_1 = jax.random.normal(k1, (B, F), jnp.float32)
    global_feat_2 = jax.random.normal(k2, (B, F), jnp.float32)

    prepared = prepare_critic_params(params)        # one-time layout prep (hoisted)

    state_value = critic_net_forward(prepared, global_feat_1, global_feat_2)
    state_value = jax.block_until_ready(state_value)

    ref = critic_net_reference(params, global_feat_1, global_feat_2)
    assert state_value.shape == (B,), state_value.shape
    # Tolerance loosened vs f32 reference: the dominant K=F*F contraction now runs
    # a single bf16 MXU pass (per perf review).
    assert jnp.allclose(state_value, ref, atol=3e-2, rtol=3e-2), (state_value, ref)

    print("KERNEL_OK")
</pallas_src>

<mosaic_0001>
module attributes {stable_mosaic.version = 11 : i64} {
  func.func @_critic_kernel(%arg0: i32, %arg1: memref<8x32xf32, #tpu.memory_space<vmem>>, %arg2: memref<8x32xf32, #tpu.memory_space<vmem>>, %arg3: memref<32x1024xf32, #tpu.memory_space<vmem>>, %arg4: memref<32x1024xf32, #tpu.memory_space<vmem>>, %arg5: memref<1024x32xbf16, #tpu.memory_space<vmem>>, %arg6: memref<32x32xf32, #tpu.memory_space<vmem>>, %arg7: memref<32x32xf32, #tpu.memory_space<vmem>>, %arg8: memref<1x49xf32, #tpu.memory_space<vmem>>, %arg9: memref<32x16xf32, #tpu.memory_space<vmem>>, %arg10: memref<16x1xf32, #tpu.memory_space<vmem>>, %arg11: memref<8x1xf32, #tpu.memory_space<vmem>>) attributes {dimension_semantics = [#tpu.dimension_semantics<parallel>], iteration_bounds = array<i64: 1>, scalar_prefetch = 0 : i64, scratch_operands = 0 : i64, tpu.core_type = #tpu.core_type<tc>, window_params = [{transform_indices = @transform_0, window_bounds = array<i64: 8, 32>}, {transform_indices = @transform_1, window_bounds = array<i64: 8, 32>}, {pipeline_mode = #tpu.pipeline_mode<synchronous>, transform_indices = @transform_2, window_bounds = array<i64: 32, 1024>}, {pipeline_mode = #tpu.pipeline_mode<synchronous>, transform_indices = @transform_3, window_bounds = array<i64: 32, 1024>}, {pipeline_mode = #tpu.pipeline_mode<synchronous>, transform_indices = @transform_4, window_bounds = array<i64: 1024, 32>}, {pipeline_mode = #tpu.pipeline_mode<synchronous>, transform_indices = @transform_5, window_bounds = array<i64: 32, 32>}, {pipeline_mode = #tpu.pipeline_mode<synchronous>, transform_indices = @transform_6, window_bounds = array<i64: 32, 32>}, {pipeline_mode = #tpu.pipeline_mode<synchronous>, transform_indices = @transform_7, window_bounds = array<i64: 1, 49>}, {pipeline_mode = #tpu.pipeline_mode<synchronous>, transform_indices = @transform_8, window_bounds = array<i64: 32, 16>}, {pipeline_mode = #tpu.pipeline_mode<synchronous>, transform_indices = @transform_9, window_bounds = array<i64: 16, 1>}, {transform_indices = @transform_10, window_bounds = array<i64: 8, 1>}]} {
    %c0 = arith.constant 0 : index
    %c0_0 = arith.constant 0 : index
    %0 = vector.load %arg1[%c0, %c0_0] : memref<8x32xf32, #tpu.memory_space<vmem>>, vector<8x32xf32>
    %c0_1 = arith.constant 0 : index
    %c0_2 = arith.constant 0 : index
    %1 = vector.load %arg2[%c0_1, %c0_2] : memref<8x32xf32, #tpu.memory_space<vmem>>, vector<8x32xf32>
    %c0_3 = arith.constant 0 : index
    %c0_4 = arith.constant 0 : index
    %2 = vector.load %arg8[%c0_3, %c0_4] : memref<1x49xf32, #tpu.memory_space<vmem>>, vector<1x49xf32>
    %3 = vector.extract_strided_slice %2 {offsets = [0, 0], sizes = [1, 32], strides = [1, 1]} : vector<1x49xf32> to vector<1x32xf32>
    %4 = vector.extract_strided_slice %2 {offsets = [0, 32], sizes = [1, 16], strides = [1, 1]} : vector<1x49xf32> to vector<1x16xf32>
    %5 = vector.extract_strided_slice %2 {offsets = [0, 48], sizes = [1, 1], strides = [1, 1]} : vector<1x49xf32> to vector<1x1xf32>
    %c0_5 = arith.constant 0 : index
    %c0_6 = arith.constant 0 : index
    %6 = vector.load %arg3[%c0_5, %c0_6] : memref<32x1024xf32, #tpu.memory_space<vmem>>, vector<32x1024xf32>
    %cst = arith.constant dense<0.000000e+00> : vector<8x1024xf32>
    %7 = tpu.matmul %0, %6, %cst {dimension_numbers = #tpu.dot_dimension_numbers<[1], [0], [0], [1], [0, 0, 1, 1], [], []>, precision = #tpu.contract_precision<fp32>} : vector<8x32xf32>, vector<32x1024xf32>, vector<8x1024xf32> -> vector<8x1024xf32>
    %c0_7 = arith.constant 0 : index
    %c0_8 = arith.constant 0 : index
    %8 = vector.load %arg4[%c0_7, %c0_8] : memref<32x1024xf32, #tpu.memory_space<vmem>>, vector<32x1024xf32>
    %cst_9 = arith.constant dense<0.000000e+00> : vector<8x1024xf32>
    %9 = tpu.matmul %1, %8, %cst_9 {dimension_numbers = #tpu.dot_dimension_numbers<[1], [0], [0], [1], [0, 0, 1, 1], [], []>, precision = #tpu.contract_precision<fp32>} : vector<8x32xf32>, vector<32x1024xf32>, vector<8x1024xf32> -> vector<8x1024xf32>
    %10 = arith.mulf %7, %9 : vector<8x1024xf32>
    %11 = arith.truncf %10 : vector<8x1024xf32> to vector<8x1024xbf16>
    %c0_10 = arith.constant 0 : index
    %c0_11 = arith.constant 0 : index
    %12 = vector.load %arg5[%c0_10, %c0_11] : memref<1024x32xbf16, #tpu.memory_space<vmem>>, vector<1024x32xbf16>
    %cst_12 = arith.constant dense<0.000000e+00> : vector<8x32xf32>
    %13 = tpu.matmul %11, %12, %cst_12 {dimension_numbers = #tpu.dot_dimension_numbers<[1], [0], [0], [1], [0, 0, 1, 1], [], []>} : vector<8x1024xbf16>, vector<1024x32xbf16>, vector<8x32xf32> -> vector<8x32xf32>
    %c0_13 = arith.constant 0 : index
    %c0_14 = arith.constant 0 : index
    %14 = vector.load %arg6[%c0_13, %c0_14] : memref<32x32xf32, #tpu.memory_space<vmem>>, vector<32x32xf32>
    %cst_15 = arith.constant dense<0.000000e+00> : vector<8x32xf32>
    %15 = tpu.matmul %0, %14, %cst_15 {dimension_numbers = #tpu.dot_dimension_numbers<[1], [0], [0], [1], [0, 0, 1, 1], [], []>, precision = #tpu.contract_precision<fp32>} : vector<8x32xf32>, vector<32x32xf32>, vector<8x32xf32> -> vector<8x32xf32>
    %c0_16 = arith.constant 0 : index
    %c0_17 = arith.constant 0 : index
    %16 = vector.load %arg7[%c0_16, %c0_17] : memref<32x32xf32, #tpu.memory_space<vmem>>, vector<32x32xf32>
    %cst_18 = arith.constant dense<0.000000e+00> : vector<8x32xf32>
    %17 = tpu.matmul %1, %16, %cst_18 {dimension_numbers = #tpu.dot_dimension_numbers<[1], [0], [0], [1], [0, 0, 1, 1], [], []>, precision = #tpu.contract_precision<fp32>} : vector<8x32xf32>, vector<32x32xf32>, vector<8x32xf32> -> vector<8x32xf32>
    %18 = arith.addf %15, %17 : vector<8x32xf32>
    %19 = arith.addf %13, %18 : vector<8x32xf32>
    %20 = vector.broadcast %3 : vector<1x32xf32> to vector<8x32xf32>
    %21 = arith.addf %19, %20 : vector<8x32xf32>
    %cst_19 = arith.constant 0.000000e+00 : f32
    %22 = vector.broadcast %cst_19 : f32 to vector<8x32xf32>
    %23 = arith.maximumf %21, %22 : vector<8x32xf32>
    %c0_20 = arith.constant 0 : index
    %c0_21 = arith.constant 0 : index
    %24 = vector.load %arg9[%c0_20, %c0_21] : memref<32x16xf32, #tpu.memory_space<vmem>>, vector<32x16xf32>
    %cst_22 = arith.constant dense<0.000000e+00> : vector<8x16xf32>
    %25 = tpu.matmul %23, %24, %cst_22 {dimension_numbers = #tpu.dot_dimension_numbers<[1], [0], [0], [1], [0, 0, 1, 1], [], []>, precision = #tpu.contract_precision<fp32>} : vector<8x32xf32>, vector<32x16xf32>, vector<8x16xf32> -> vector<8x16xf32>
    %26 = vector.broadcast %4 : vector<1x16xf32> to vector<8x16xf32>
    %27 = arith.addf %25, %26 : vector<8x16xf32>
    %cst_23 = arith.constant 0.000000e+00 : f32
    %28 = vector.broadcast %cst_23 : f32 to vector<8x16xf32>
    %29 = arith.maximumf %27, %28 : vector<8x16xf32>
    %c0_24 = arith.constant 0 : index
    %c0_25 = arith.constant 0 : index
    %30 = vector.load %arg10[%c0_24, %c0_25] : memref<16x1xf32, #tpu.memory_space<vmem>>, vector<16x1xf32>
    %cst_26 = arith.constant dense<0.000000e+00> : vector<8x1xf32>
    %31 = tpu.matmul %29, %30, %cst_26 {dimension_numbers = #tpu.dot_dimension_numbers<[1], [0], [0], [1], [0, 0, 1, 1], [], []>, precision = #tpu.contract_precision<fp32>} : vector<8x16xf32>, vector<16x1xf32>, vector<8x1xf32> -> vector<8x1xf32>
    %32 = vector.broadcast %5 : vector<1x1xf32> to vector<8x1xf32>
    %33 = arith.addf %31, %32 : vector<8x1xf32>
    %34 = math.tanh %33 : vector<8x1xf32>
    %c0_27 = arith.constant 0 : index
    %c0_28 = arith.constant 0 : index
    %35 = vector.load %arg11[%c0_27, %c0_28] : memref<8x1xf32, #tpu.memory_space<vmem>>, vector<8x1xf32>
    tpu.vector_store %arg11[%c0_27, %c0_28], %34 {strides = array<i32>} : memref<8x1xf32, #tpu.memory_space<vmem>>, vector<8x1xf32>,
    return
  }
  func.func @transform_0(%arg0: i32) -> (i32, i32) {
    %c0_i32 = arith.constant 0 : i32
    %c0_i32_0 = arith.constant 0 : i32
    return %arg0, %c0_i32 : i32, i32
  }
  func.func @transform_1(%arg0: i32) -> (i32, i32) {
    %c0_i32 = arith.constant 0 : i32
    %c0_i32_0 = arith.constant 0 : i32
    return %arg0, %c0_i32 : i32, i32
  }
  func.func @transform_2(%arg0: i32) -> (i32, i32) {
    %c0_i32 = arith.constant 0 : i32
    %c0_i32_0 = arith.constant 0 : i32
    %c0_i32_1 = arith.constant 0 : i32
    return %c0_i32, %c0_i32_0 : i32, i32
  }
  func.func @transform_3(%arg0: i32) -> (i32, i32) {
    %c0_i32 = arith.constant 0 : i32
    %c0_i32_0 = arith.constant 0 : i32
    %c0_i32_1 = arith.constant 0 : i32
    return %c0_i32, %c0_i32_0 : i32, i32
  }
  func.func @transform_4(%arg0: i32) -> (i32, i32) {
    %c0_i32 = arith.constant 0 : i32
    %c0_i32_0 = arith.constant 0 : i32
    %c0_i32_1 = arith.constant 0 : i32
    return %c0_i32, %c0_i32_0 : i32, i32
  }
  func.func @transform_5(%arg0: i32) -> (i32, i32) {
    %c0_i32 = arith.constant 0 : i32
    %c0_i32_0 = arith.constant 0 : i32
    %c0_i32_1 = arith.constant 0 : i32
    return %c0_i32, %c0_i32_0 : i32, i32
  }
  func.func @transform_6(%arg0: i32) -> (i32, i32) {
    %c0_i32 = arith.constant 0 : i32
    %c0_i32_0 = arith.constant 0 : i32
    %c0_i32_1 = arith.constant 0 : i32
    return %c0_i32, %c0_i32_0 : i32, i32
  }
  func.func @transform_7(%arg0: i32) -> (i32, i32) {
    %c0_i32 = arith.constant 0 : i32
    %c0_i32_0 = arith.constant 0 : i32
    %c0_i32_1 = arith.constant 0 : i32
    return %c0_i32, %c0_i32_0 : i32, i32
  }
  func.func @transform_8(%arg0: i32) -> (i32, i32) {
    %c0_i32 = arith.constant 0 : i32
    %c0_i32_0 = arith.constant 0 : i32
    %c0_i32_1 = arith.constant 0 : i32
    return %c0_i32, %c0_i32_0 : i32, i32
  }
  func.func @transform_9(%arg0: i32) -> (i32, i32) {
    %c0_i32 = arith.constant 0 : i32
    %c0_i32_0 = arith.constant 0 : i32
    %c0_i32_1 = arith.constant 0 : i32
    return %c0_i32, %c0_i32_0 : i32, i32
  }
  func.func @transform_10(%arg0: i32) -> (i32, i32) {
    %c0_i32 = arith.constant 0 : i32
    %c0_i32_0 = arith.constant 0 : i32
    return %arg0, %c0_i32 : i32, i32
  }
}

</mosaic_0001>

<bundles_post_ra>
// kernel: critic_net_forward.1
= control target key start
LH: loop header
LB: loop body
LE: loop exit
PB: predicated region body
PF: predicated region fallthrough
CT: control target
= control target key end

     0   :  { %v8283_v3 = vmov 0.0   ;;  %vm71_vm0 = vcmask 261120   ;;  %vm8285_vm1 = vmmov 0   ;;  %s8286_s11 = smov 96   ;;  %vm6629_vm2 = vcmask 130048   ;;  %s9940_s2 = inlined_call_operand.vmem [shape: f32[32,1024], index: 2, kind: input, shape index: {}]   ;;  %s9941_s0 = inlined_call_operand.vmem [shape: f32[8,32], index: 0, kind: input, shape index: {}]   ;;  %s9942_s3 = inlined_call_operand.vmem [shape: f32[32,1024], index: 3, kind: input, shape index: {}]   ;;  %s9943_s1 = inlined_call_operand.vmem [shape: f32[8,32], index: 1, kind: input, shape index: {}]   ;;  %s9944_s6 = inlined_call_operand.vmem [shape: f32[32,32], index: 6, kind: input, shape index: {}]   ;;  %s9945_s5 = inlined_call_operand.vmem [shape: f32[32,32], index: 5, kind: input, shape index: {}]   ;;  %s9946_s4 = inlined_call_operand.vmem [shape: bf16[1024,32], index: 4, kind: input, shape index: {}]   ;;  %s9947_s8 = inlined_call_operand.vmem [shape: f32[32,16], index: 8, kind: input, shape index: {}]   ;;  %s9948_s7 = inlined_call_operand.vmem [shape: f32[1,49], index: 7, kind: input, shape index: {}]   ;;  %s9949_s9 = inlined_call_operand.vmem [shape: f32[16,1], index: 9, kind: input, shape index: {}]   ;;  %s9950_s10 = inlined_call_operand.vmem [shape: f32[8,1], index: 10, kind: output, shape index: {}]  }
   0x1   :  { %v40_v0 = vld [vmem:[%s9940_s2 + $0x8] sm:$0xff]  ;;  %v39_v2 = vld [vmem:[%s9940_s2] sm:$0xff]  ;;  %147 = vmatprep.mubr.f32.mxu1 %v8283_v3  ;;  %263 = vmatprep.mubr.f32.mxu0 %v8283_v3  ;;  %v42_v20 = vld [vmem:[%s9940_s2 + $0x18] sm:$0xff]  ;;  %vm7093_vm3 = vcmask 7168  }
   0x2   :  { %v48_v1 = vld [vmem:[%s9940_s2 + $0x48] sm:$0xff]  ;;  %v75_v4 = vand.u32 4294901760, %v40_v0  ;;  %v47_v6 = vld [vmem:[%s9940_s2 + $0x40] sm:$0xff]  ;;  %v77_v7 = vand.u32 4294901760, %v39_v2  ;;  %v50_v24 = vld [vmem:[%s9940_s2 + $0x58] sm:$0xff]  ;;  %v618_v33 = vand.u32 4294901760, %v42_v20 }
   0x3   :  { %v79_v5 = vand.u32 4294901760, %v48_v1  ;;  %v56_v8 = vld [vmem:[%s9940_s2 + $0x88] sm:$0xff]  ;;  %v81_v10 = vand.u32 4294901760, %v47_v6  ;;  %v55_v13 = vld [vmem:[%s9940_s2 + $0x80] sm:$0xff]  ;;  %v41_v29 = vld [vmem:[%s9940_s2 + $0x10] sm:$0xff]  ;;  %v622_v35 = vand.u32 4294901760, %v50_v24 }
   0x4   :  { %v64_v9 = vld [vmem:[%s9940_s2 + $0xc8] sm:$0xff]  ;;  %v83_v11 = vand.u32 4294901760, %v56_v8  ;;  %v63_v14 = vld [vmem:[%s9940_s2 + $0xc0] sm:$0xff]  ;;  %v8371_v16 = vsub.f32 %v39_v2, %v77_v7  ;;  %v85_v17 = vand.u32 4294901760, %v55_v13  ;;  %v8402_v31 = vsub.f32 %v40_v0, %v75_v4  ;;  %v49_v38 = vld [vmem:[%s9940_s2 + $0x50] sm:$0xff] }
   0x5   :  { %v87_v12 = vand.u32 4294901760, %v64_v9  ;;  %v8369_v15 = vpack.c.bf16 %v79_v5, %v75_v4  ;;  %v89_v18 = vand.u32 4294901760, %v63_v14  ;;  %v36_v19 = vld [vmem:[%s9941_s0] sm:$0xff]  ;;  %v8379_v21 = vpack.c.bf16 %v81_v10, %v77_v7  ;;  %v58_v55 = vld [vmem:[%s9940_s2 + $0x98] sm:$0xff]  ;;  %v65_v7 = vld [vmem:[%s9940_s2 + $0xd0] sm:$0xff] }
   0x6   :  { %v8381_v22 = vsub.f32 %v47_v6, %v81_v10  ;;  %v8389_v25 = vsub.f32 %v56_v8, %v83_v11  ;;  %v8395_v28 = vsub.f32 %v55_v13, %v85_v17  ;;  %v73_v30 = vsel %vm71_vm0, %v36_v19, 0  ;;  %v66_v56 = vld [vmem:[%s9940_s2 + $0xd8] sm:$0xff]  ;;  %v57_v6 = vld [vmem:[%s9940_s2 + $0x90] sm:$0xff] }
   0x7   :  { %v8383_v23 = vpack.c.bf16 %v87_v12, %v83_v11  ;;  %7601 = vmatprep.subr.bf16.mxu1 %v8369_v15  ;;  %v8391_v26 = vsub.f32 %v64_v9, %v87_v12  ;;  %v8393_v27 = vpack.c.bf16 %v89_v18, %v85_v17  ;;  %v8404_v32 = vsub.f32 %v48_v1, %v79_v5 }
   0x8   :  { %7603 = vmatpush1.bf16.msra.mxu1 %v8379_v21  ;;  %v8407_v34 = vand.u32 4294901760, %v73_v30  ;;  %v167_v36 = vand.u32 4294901760, %v8371_v16  ;;  %v179_v37 = vand.u32 4294901760, %v8381_v22  ;;  %v8414_v39 = vsub.f32 %v63_v14, %v89_v18 }
   0x9   :  { %7605 = vmatprep.subr.bf16.mxu1 %v8383_v23  ;;  %v161_v40 = vand.u32 4294901760, %v8402_v31  ;;  %v173_v41 = vand.u32 4294901760, %v8404_v32  ;;  %v620_v42 = vand.u32 4294901760, %v41_v29  ;;  %v8421_v44 = vpack.c.bf16 %v622_v35, %v618_v33 }
   0xa   :  { %v8419_v43 = vsub.f32 %v73_v30, %v8407_v34  ;;  %v8423_v45 = vsub.f32 %v42_v20, %v618_v33  ;;  %v168_v46 = vsub.f32 %v8371_v16, %v167_v36  ;;  %v180_v49 = vsub.f32 %v8381_v22, %v179_v37 }
   0xb   :  { %v162_v47 = vsub.f32 %v8402_v31, %v161_v40  ;;  %v174_v48 = vsub.f32 %v8404_v32, %v173_v41  ;;  %v624_v50 = vand.u32 4294901760, %v49_v38  ;;  %v8442_v52 = vsub.f32 %v50_v24, %v622_v35 }
   0xc   :  { %7607 = vmatpush1.bf16.msra.mxu1 %v8393_v27  ;;  %v8439_v51 = vand.u32 4294901760, %v8419_v43  ;;  %v169_v53 = vand.u32 4294901760, %v168_v46  ;;  %v185_v54 = vand.u32 4294901760, %v8389_v25  ;;  %v181_v59 = vand.u32 4294901760, %v180_v49 }
   0xd   :  { %7649 = vmatprep.subr.bf16.mxu1 %v8421_v44  ;;  %v163_v57 = vand.u32 4294901760, %v162_v47  ;;  %v175_v58 = vand.u32 4294901760, %v174_v48  ;;  %v8451_v60 = vsub.f32 %v41_v29, %v620_v42  ;;  %v8455_v62 = vpack.c.bf16 %v624_v50, %v620_v42 }
   0xe   :  { %v151_v61 = vsub.f32 %v8419_v43, %v8439_v51  ;;  %v186_v63 = vsub.f32 %v8389_v25, %v185_v54  ;;  %v197_v0 = vand.u32 4294901760, %v8391_v26  ;;  %v7610_v2 = vpack.c.bf16 %v181_v59, %v169_v53 }
   0xf   :  { %v7608_v1 = vpack.c.bf16 %v175_v58, %v163_v57  ;;  %v626_v4 = vand.u32 4294901760, %v58_v55  ;;  %v630_v5 = vand.u32 4294901760, %v66_v56  ;;  %v191_v11 = vand.u32 4294901760, %v8395_v28 }
  0x10   :  { %v8467_v8 = vand.u32 4294901760, %v151_v61  ;;  %v187_v9 = vand.u32 4294901760, %v186_v63  ;;  %v198_v10 = vsub.f32 %v8391_v26, %v197_v0  ;;  %v8473_v12 = vsub.f32 %v49_v38, %v624_v50 }
  0x11   :  { %7609 = vmatprep.subr.bf16.mxu0 %v7608_v1  ;;  %v8475_v13 = vpack.c.bf16 %v630_v5, %v626_v4  ;;  %v8477_v14 = vsub.f32 %v58_v55, %v626_v4  ;;  %v203_v17 = vand.u32 4294901760, %v8414_v39  ;;  %v192_v19 = vsub.f32 %v8395_v28, %v191_v11 }
  0x12   :  { %153 = vmatmul.mubr.f32.vlgmr.msra.gmra.mrb[0].mxu1 %v8467_v8  ;;  %7611 = vmatpush1.bf16.msra.mxu0 %v7610_v2  ;;  %v199_v18 = vand.u32 4294901760, %v198_v10  ;;  %v628_v20 = vand.u32 4294901760, %v57_v6  ;;  %v632_v24 = vand.u32 4294901760, %v65_v7  ;;  %v8485_v29 = vsub.f32 %v66_v56, %v630_v5 }
  0x13   :  { %7651 = vmatpush1.bf16.msra.mxu1 %v8455_v62  ;;  %v204_v30 = vsub.f32 %v8414_v39, %v203_v17  ;;  %690 = vmatprep.mubr.f32.mxu1 %v8283_v3  ;;  %v704_v33 = vand.u32 4294901760, %v8423_v45  ;;  %v716_v35 = vand.u32 4294901760, %v8442_v52  ;;  %v193_v42 = vand.u32 4294901760, %v192_v19 }
  0x14   :  { %v7612_v38 = vpack.c.bf16 %v199_v18, %v187_v9  ;;  %7653 = vmatprep.subr.bf16.mxu1 %v8475_v13  ;;  %v8494_v46 = vpack.c.bf16 %v632_v24, %v628_v20  ;;  %v8496_v47 = vsub.f32 %v57_v6, %v628_v20  ;;  %v8498_v49 = vsub.f32 %v65_v7, %v632_v24 }
  0x15   :  { %v205_v48 = vand.u32 4294901760, %v204_v30  ;;  %v705_v50 = vsub.f32 %v8423_v45, %v704_v33  ;;  %v717_v53 = vsub.f32 %v8442_v52, %v716_v35  ;;  %v7616_v55 = vpack.c.bf16 %v8404_v32, %v8402_v31  ;;  %v43_v31 = vld [vmem:[%s9940_s2 + $0x20] sm:$0xff] }
  0x16   :  { %7613 = vmatprep.subr.bf16.mxu0 %v7612_v38  ;;  %v710_v56 = vand.u32 4294901760, %v8451_v60  ;;  %v722_v57 = vand.u32 4294901760, %v8473_v12  ;;  %v728_v63 = vand.u32 4294901760, %v8477_v14  ;;  %v7618_v1 = vpack.c.bf16 %v8381_v22, %v8371_v16  ;;  %v51_v32 = vld [vmem:[%s9940_s2 + $0x60] sm:$0xff]  ;;  %v60_v16 = vld [vmem:[%s9940_s2 + $0xa8] sm:$0xff] }
  0x17   :  { %v7614_v58 = vpack.c.bf16 %v205_v48, %v193_v42  ;;  %7655 = vmatpush1.bf16.msra.mxu1 %v8494_v46  ;;  %v706_v59 = vand.u32 4294901760, %v705_v50  ;;  %v718_v61 = vand.u32 4294901760, %v717_v53  ;;  %v740_v5 = vand.u32 4294901760, %v8485_v29  ;;  %v68_v22 = vld [vmem:[%s9940_s2 + $0xe8] sm:$0xff] }
  0x18   :  { %v711_v2 = vsub.f32 %v8451_v60, %v710_v56  ;;  %v723_v4 = vsub.f32 %v8473_v12, %v722_v57  ;;  %v729_v7 = vsub.f32 %v8477_v14, %v728_v63  ;;  %v734_v9 = vand.u32 4294901760, %v8496_v47 }
  0x19   :  { %7615 = vmatpush1.bf16.msra.mxu0 %v7614_v58  ;;  %v7656_v6 = vpack.c.bf16 %v718_v61, %v706_v59  ;;  %v746_v10 = vand.u32 4294901760, %v8498_v49  ;;  %v7620_v20 = vpack.c.bf16 %v8391_v26, %v8389_v25  ;;  %v741_v24 = vsub.f32 %v8485_v29, %v740_v5 }
  0x1a   :  { %7617 = vmatprep.subr.bf16.mxu0 %v7616_v55  ;;  %696 = vmatmul.mubr.f32.vlgmr.msra.gmra.mrb[2].mxu1 %v8467_v8  ;;  %v712_v18 = vand.u32 4294901760, %v711_v2  ;;  %v724_v19 = vand.u32 4294901760, %v723_v4  ;;  %v730_v30 = vand.u32 4294901760, %v729_v7  ;;  %v735_v38 = vsub.f32 %v8496_v47, %v734_v9  ;;  %v52_v7 = vld [vmem:[%s9940_s2 + $0x68] sm:$0xff] }
  0x1b   :  { %7657 = vmatprep.subr.bf16.mxu1 %v7656_v6  ;;  %v747_v42 = vsub.f32 %v8498_v49, %v746_v10  ;;  %806 = vmatprep.mubr.f32.mxu1 %v8283_v3  ;;  %v742_v50 = vand.u32 4294901760, %v741_v24  ;;  %v7622_v53 = vpack.c.bf16 %v8414_v39, %v8395_v28  ;;  %v7664_v2 = vpack.c.bf16 %v8442_v52, %v8423_v45  ;;  %v44_v6 = vld [vmem:[%s9940_s2 + $0x28] sm:$0xff]  ;;  %v8628_v45 = vld [vmem:[%s9940_s2 + $0x78] sm:$0xff] }
  0x1c   :  { %265 = vmatmul.mubr.f32.vlgmr.msra.gmra.mrb[0].mxu0 %v8407_v34  ;;  %v7658_v48 = vpack.c.bf16 %v724_v19, %v712_v18  ;;  %v736_v55 = vand.u32 4294901760, %v735_v38  ;;  %v7668_v4 = vpack.c.bf16 %v8485_v29, %v8477_v14  ;;  %v7670_v18 = vpack.c.bf16 %v8498_v49, %v8496_v47  ;;  %v59_v38 = vld [vmem:[%s9940_s2 + $0xa0] sm:$0xff]  ;;  %v8662_v14 = vld [vmem:[%s9940_s2 + $0x70] sm:$0xff] }
  0x1d   :  { %7619 = vmatpush1.bf16.msra.mxu0 %v7618_v1  ;;  %v748_v58 = vand.u32 4294901760, %v747_v42  ;;  %351 = vmatprep.mubr.f32.mxu0 %v8283_v3  ;;  %v7660_v59 = vpack.c.bf16 %v742_v50, %v730_v30  ;;  %v7666_v1 = vpack.c.bf16 %v8473_v12, %v8451_v60  ;;  %v7632_v19 = vpack.c.bf16 %v173_v41, %v161_v40  ;;  %v67_v42 = vld [vmem:[%s9940_s2 + $0xe0] sm:$0xff]  ;;  %v8623_v50 = vld [vmem:[%s9940_s2 + $0x38] sm:$0xff]  ;;  %v8657_v12 = vld [vmem:[%s9940_s2 + $0x30] sm:$0xff] }
  0x1e   :  { %7659 = vmatpush1.bf16.msra.mxu1 %v7658_v48  ;;  %7621 = vmatprep.subr.bf16.mxu0 %v7620_v20  ;;  %v1161_v20 = vand.u32 4294901760, %v44_v6  ;;  %v1165_v24 = vand.u32 4294901760, %v52_v7  ;;  %v7634_v30 = vpack.c.bf16 %v179_v37, %v167_v36  ;;  %v7636_v40 = vpack.c.bf16 %v197_v0, %v185_v54 }
  0x1f   :  { %v7662_v61 = vpack.c.bf16 %v748_v58, %v736_v55  ;;  %7661 = vmatprep.subr.bf16.mxu1 %v7660_v59  ;;  %v1163_v25 = vand.u32 4294901760, %v43_v31  ;;  %v1167_v41 = vand.u32 4294901760, %v51_v32  ;;  %v7638_v26 = vpack.c.bf16 %v203_v17, %v191_v11 }
  0x20   :  { %v8591_v36 = vsub.f32 %v44_v6, %v1161_v20  ;;  %v8593_v37 = vsub.f32 %v52_v7, %v1165_v24  ;;  %v1169_v54 = vand.u32 4294901760, %v60_v16  ;;  %v1173_v0 = vand.u32 4294901760, %v68_v22 }
  0x21   :  { %7623 = vmatpush1.bf16.msra.mxu0 %v7622_v53  ;;  %v7680_v28 = vpack.c.bf16 %v716_v35, %v704_v33  ;;  %v8614_v39 = vsub.f32 %v43_v31, %v1163_v25  ;;  %v8616_v11 = vsub.f32 %v51_v32, %v1167_v41  ;;  %v1171_v35 = vand.u32 4294901760, %v59_v38 }
  0x22   :  { %7663 = vmatpush1.bf16.msra.mxu1 %v7662_v61  ;;  %7625 = vmatprep.subr.bf16.mxu0 %v8369_v15  ;;  %v1247_v17 = vand.u32 4294901760, %v8591_v36  ;;  %v1259_v48 = vand.u32 4294901760, %v8593_v37  ;;  %v8630_v52 = vsub.f32 %v60_v16, %v1169_v54  ;;  %v8632_v33 = vsub.f32 %v68_v22, %v1173_v0 }
  0x23   :  { %7665 = vmatprep.subr.bf16.mxu1 %v7664_v2  ;;  %v1175_v53 = vand.u32 4294901760, %v67_v42  ;;  %v7682_v55 = vpack.c.bf16 %v722_v57, %v710_v56  ;;  %v7684_v58 = vpack.c.bf16 %v740_v5, %v728_v63  ;;  %v7686_v59 = vpack.c.bf16 %v746_v10, %v734_v9  ;;  %v8676_v57 = vld [vmem:[%s9940_s2 + $0xb8] sm:$0xff] }
  0x24   :  { %354 = vmatmul.mubr.f32.vlgmr.msra.gmra.mrb[0].mxu0 %v8419_v43  ;;  %v8648_v61 = vpack.c.bf16 %v1165_v24, %v1161_v20  ;;  %v8650_v2 = vpack.c.bf16 %v1167_v41, %v1163_v25  ;;  %v1708_v60 = vand.u32 4294901760, %v8628_v45  ;;  %v1248_v29 = vsub.f32 %v8591_v36, %v1247_v17  ;;  %v8681_v63 = vld [vmem:[%s9940_s2 + $0xf8] sm:$0xff]  ;;  %v8710_v24 = vld [vmem:[%s9940_s2 + $0xb0] sm:$0xff] }
  0x25   :  { %808 = vmatmul.mubr.f32.vlgmr.msra.gmra.mrb[2].mxu1 %v8407_v34  ;;  %7627 = vmatpush1.bf16.msra.mxu0 %v8379_v21  ;;  %v1260_v47 = vsub.f32 %v8593_v37, %v1259_v48  ;;  %v1253_v49 = vand.u32 4294901760, %v8614_v39  ;;  %v1265_v56 = vand.u32 4294901760, %v8616_v11  ;;  %v8685_v5 = vsub.f32 %v59_v38, %v1171_v35 }
  0x26   :  { %7667 = vmatpush1.bf16.msra.mxu1 %v7666_v1  ;;  %7629 = vmatprep.subr.bf16.mxu0 %v8383_v23  ;;  %v8687_v9 = vsub.f32 %v67_v42, %v1175_v53  ;;  %v1271_v10 = vand.u32 4294901760, %v8630_v52  ;;  %v1283_v1 = vand.u32 4294901760, %v8632_v33  ;;  %v8694_v6 = vpack.c.bf16 %v1175_v53, %v1171_v35 }
  0x27   :  { %7669 = vmatprep.subr.bf16.mxu1 %v7668_v4  ;;  %432 = vmatprep.mubr.f32.mxu0 %v8283_v3  ;;  %v8692_v4 = vpack.c.bf16 %v1173_v0, %v1169_v54  ;;  %v1706_v7 = vand.u32 4294901760, %v8657_v12  ;;  %v1712_v20 = vand.u32 4294901760, %v8676_v57  ;;  %v1249_v31 = vand.u32 4294901760, %v1248_v29 }
  0x28   :  { %894 = vmatprep.mubr.f32.mxu1 %v8283_v3  ;;  %v1261_v32 = vand.u32 4294901760, %v1260_v47  ;;  %v1266_v16 = vsub.f32 %v8616_v11, %v1265_v56  ;;  %v1272_v22 = vsub.f32 %v8630_v52, %v1271_v10  ;;  %v1284_v25 = vsub.f32 %v8632_v33, %v1283_v1 }
  0x29   :  { %7631 = vmatpush1.bf16.msra.mxu0 %v8393_v27  ;;  %v1277_v41 = vand.u32 4294901760, %v8685_v5  ;;  %v8735_v54 = vsub.f32 %v8657_v12, %v1706_v7  ;;  %v1714_v0 = vand.u32 4294901760, %v8710_v24  ;;  %v8744_v42 = vsub.f32 %v8676_v57, %v1712_v20 }
  0x2a   :  { %7671 = vmatpush1.bf16.msra.mxu1 %v7670_v18  ;;  %7633 = vmatprep.subr.bf16.mxu0 %v7632_v19  ;;  %v1710_v18 = vand.u32 4294901760, %v8662_v14  ;;  %v8703_v19 = vsub.f32 %v8628_v45, %v1708_v60  ;;  %v7704_v35 = vpack.c.bf16 %v1261_v32, %v1249_v31 }
  0x2b   :  { %7673 = vmatprep.subr.bf16.mxu1 %v8421_v44  ;;  %v1278_v12 = vsub.f32 %v8685_v5, %v1277_v41  ;;  %v1796_v29 = vand.u32 4294901760, %v8735_v54 }
  0x2c   :  { %436 = vmatmul.mubr.f32.vlgmr.msra.gmra.mrb[0].mxu0 %v8439_v51  ;;  %v1802_v45 = vand.u32 4294901760, %v8703_v19  ;;  %v8783_v31 = vpack.c.bf16 %v1710_v18, %v1706_v7 }
  0x2d   :  { %897 = vmatmul.mubr.f32.vlgmr.msra.gmra.mrb[2].mxu1 %v8419_v43  ;;  %7635 = vmatpush1.bf16.msra.mxu0 %v7634_v30  ;;  %v8715_v30 = vld [vmem:[%s9940_s2 + $0xf0] sm:$0xff] }
  0x2e   :  { %7675 = vmatpush1.bf16.msra.mxu1 %v8455_v62  ;;  %7637 = vmatprep.subr.bf16.mxu0 %v7636_v40  ;;  %v1254_v40 = vsub.f32 %v8614_v39, %v1253_v49  ;;  %v1718_v38 = vand.u32 4294901760, %v8715_v30  ;;  %v1803_v57 = vsub.f32 %v8703_v19, %v1802_v45 }
  0x2f   :  { %7677 = vmatprep.subr.bf16.mxu1 %v8475_v13  ;;  %530 = vmatprep.mubr.f32.mxu0 %v8283_v3 }
  0x30   :  { %975 = vmatprep.mubr.f32.mxu1 %v8283_v3 }
  0x31   :  { %7639 = vmatpush1.bf16.msra.mxu0 %v7638_v26  ;;  %v1289_v26 = vand.u32 4294901760, %v8687_v9 }
  0x32   :  { %7679 = vmatpush1.bf16.msra.mxu1 %v8494_v46  ;;  %7641 = vmatprep.subr.bf16.mxu0 %v8369_v15  ;;  %v1704_v15 = vand.u32 4294901760, %v8623_v50 }
  0x33   :  { %7681 = vmatprep.subr.bf16.mxu1 %v7680_v28 }
  0x34   :  { %532 = vmatmul.mubr.f32.vlgmr.msra.gmra.mrb[0].mxu0 %v8407_v34  ;;  %v8752_v53 = vpack.c.bf16 %v1708_v60, %v1704_v15  ;;  %v8768_v60 = vsub.f32 %v8715_v30, %v1718_v38 }
  0x35   :  { %979 = vmatmul.mubr.f32.vlgmr.msra.gmra.mrb[2].mxu1 %v8439_v51  ;;  %7643 = vmatpush1.bf16.msra.mxu0 %v8379_v21  ;;  %v8700_v21 = vsub.f32 %v8623_v50, %v1704_v15  ;;  %v8765_v15 = vsub.f32 %v8710_v24, %v1714_v0 }
  0x36   :  { %7683 = vmatpush1.bf16.msra.mxu1 %v7682_v55  ;;  %7645 = vmatprep.subr.bf16.mxu0 %v8383_v23  ;;  %v1716_v23 = vand.u32 4294901760, %v8681_v63  ;;  %v1255_v55 = vand.u32 4294901760, %v1254_v40  ;;  %v1279_v40 = vand.u32 4294901760, %v1278_v12 }
  0x37   :  { %7685 = vmatprep.subr.bf16.mxu1 %v7684_v58  ;;  %610 = vmatprep.mubr.f32.mxu0 %v8283_v3  ;;  %v1790_v50 = vand.u32 4294901760, %v8700_v21  ;;  %v1267_v58 = vand.u32 4294901760, %v1266_v16  ;;  %v1820_v7 = vand.u32 4294901760, %v8765_v15 }
  0x38   :  { %1073 = vmatprep.mubr.f32.mxu1 %v8283_v3  ;;  %v8747_v28 = vsub.f32 %v8681_v63, %v1716_v23  ;;  %v1814_v63 = vand.u32 4294901760, %v8744_v42  ;;  %v8786_v32 = vpack.c.bf16 %v1716_v23, %v1712_v20  ;;  %v1804_v23 = vand.u32 4294901760, %v1803_v57 }
  0x39   :  { %7647 = vmatpush1.bf16.msra.mxu0 %v8393_v27  ;;  %v8738_v27 = vsub.f32 %v8662_v14, %v1710_v18  ;;  %v1290_v14 = vsub.f32 %v8687_v9, %v1289_v26  ;;  %v7706_v30 = vpack.c.bf16 %v1267_v58, %v1255_v55  ;;  %v1832_v18 = vand.u32 4294901760, %v8768_v60 }
  0x3a   :  { %7687 = vmatpush1.bf16.msra.mxu1 %v7686_v59  ;;  %7697 = vmatprep.subr.bf16.mxu0 %v8648_v61  ;;  %v1285_v59 = vand.u32 4294901760, %v1284_v25  ;;  %v1826_v24 = vand.u32 4294901760, %v8747_v28  ;;  %v8806_v58 = vpack.c.bf16 %v1718_v38, %v1714_v0 }
  0x3b   :  { %7689 = vmatprep.subr.bf16.mxu1 %v8421_v44  ;;  %v1273_v44 = vand.u32 4294901760, %v1272_v22  ;;  %v1808_v47 = vand.u32 4294901760, %v8738_v27  ;;  %v1291_v16 = vand.u32 4294901760, %v1290_v14  ;;  %v1797_v22 = vsub.f32 %v8735_v54, %v1796_v29 }
  0x3c   :  { %612 = vmatmul.mubr.f32.vlgmr.msra.gmra.mrb[0].mxu0 %v8407_v34  ;;  %v1821_v14 = vsub.f32 %v8765_v15, %v1820_v7 }
  0x3d   :  { %1075 = vmatmul.mubr.f32.vlgmr.msra.gmra.mrb[2].mxu1 %v8407_v34  ;;  %7699 = vmatpush1.bf16.msra.mxu0 %v8650_v2  ;;  %v1809_v25 = vsub.f32 %v8738_v27, %v1808_v47  ;;  %v7710_v55 = vpack.c.bf16 %v1291_v16, %v1279_v40  ;;  %v7716_v40 = vpack.c.bf16 %v8632_v33, %v8630_v52 }
  0x3e   :  { %7691 = vmatpush1.bf16.msra.mxu1 %v8455_v62  ;;  %7701 = vmatprep.subr.bf16.mxu0 %v8692_v4  ;;  %v1791_v62 = vsub.f32 %v8700_v21, %v1790_v50  ;;  %v1822_v16 = vand.u32 4294901760, %v1821_v14  ;;  %v7728_v14 = vpack.c.bf16 %v1259_v48, %v1247_v17  ;;  %v7732_v17 = vpack.c.bf16 %v1283_v1, %v1271_v10  ;;  %v2264_v48 = vld [vmem:[%s9942_s3 + $0x88] sm:$0xff]  ;;  %v2263_v10 = vld [vmem:[%s9942_s3 + $0x80] sm:$0xff] }
  0x3f   :  { %7693 = vmatprep.subr.bf16.mxu1 %v8475_v13  ;;  %1153 = vmatprep.mubr.f32.mxu1 %v8283_v3  ;;  %v7708_v13 = vpack.c.bf16 %v1285_v59, %v1273_v44  ;;  %v7712_v44 = vpack.c.bf16 %v8593_v37, %v8591_v36  ;;  %v1798_v59 = vand.u32 4294901760, %v1797_v22  ;;  %v1810_v12 = vand.u32 4294901760, %v1809_v25  ;;  %v2255_v37 = vld [vmem:[%s9942_s3 + $0x40] sm:$0xff] }
  0x40   :  { %1233 = vmatprep.mubr.f32.mxu0 %v8283_v3  ;;  %v1792_v20 = vand.u32 4294901760, %v1791_v62  ;;  %v1833_v62 = vsub.f32 %v8768_v60, %v1832_v18  ;;  %v7730_v36 = vpack.c.bf16 %v1265_v56, %v1253_v49  ;;  %v2288_v56 = vand.u32 4294901760, %v2255_v37  ;;  %v2271_v1 = vld [vmem:[%s9942_s3 + $0xc0] sm:$0xff] }
  0x41   :  { %7703 = vmatpush1.bf16.msra.mxu0 %v8694_v6 }
  0x42   :  { %7695 = vmatpush1.bf16.msra.mxu1 %v8494_v46  ;;  %7705 = vmatprep.subr.bf16.mxu0 %v7704_v35  ;;  %v1815_v46 = vsub.f32 %v8744_v42, %v1814_v63  ;;  %v1827_v35 = vsub.f32 %v8747_v28, %v1826_v24  ;;  %v7752_v0 = vpack.c.bf16 %v1804_v23, %v1792_v20  ;;  %v1834_v22 = vand.u32 4294901760, %v1833_v62 }
  0x43   :  { %7745 = vmatprep.subr.bf16.mxu1 %v8752_v53  ;;  %v7718_v20 = vpack.c.bf16 %v8687_v9, %v8685_v5  ;;  %v2292_v9 = vand.u32 4294901760, %v2263_v10 }
  0x44   :  { %1239 = vmatmul.mubr.f32.vlgmr.msra.gmra.mrb[2].mxu0 %v8467_v8  ;;  %v1816_v38 = vand.u32 4294901760, %v1815_v46  ;;  %v1828_v57 = vand.u32 4294901760, %v1827_v35  ;;  %v7758_v23 = vpack.c.bf16 %v1834_v22, %v1822_v16  ;;  %v7760_v46 = vpack.c.bf16 %v8703_v19, %v8700_v21  ;;  %v2258_v22 = vld [vmem:[%s9942_s3 + $0x58] sm:$0xff] }
  0x45   :  { %1155 = vmatmul.mubr.f32.vlgmr.msra.gmra.mrb[2].mxu1 %v8407_v34  ;;  %7707 = vmatpush1.bf16.msra.mxu0 %v7706_v30  ;;  %v7714_v30 = vpack.c.bf16 %v8616_v11, %v8614_v39  ;;  %v7762_v35 = vpack.c.bf16 %v8738_v27, %v8735_v54  ;;  %v2272_v39 = vld [vmem:[%s9942_s3 + $0xc8] sm:$0xff]  ;;  %v37_v11 = vld [vmem:[%s9943_s1] sm:$0xff]  ;;  %v7776_v16 = vpack.c.bf16 %v1802_v45, %v1790_v50 }
  0x46   :  { %7747 = vmatpush1.bf16.msra.mxu1 %v8783_v31  ;;  %7709 = vmatprep.subr.bf16.mxu0 %v7708_v13  ;;  %v7754_v13 = vpack.c.bf16 %v1810_v12, %v1798_v59  ;;  %v7756_v25 = vpack.c.bf16 %v1828_v57, %v1816_v38  ;;  %v2256_v59 = vld [vmem:[%s9942_s3 + $0x48] sm:$0xff]  ;;  %v7766_v12 = vpack.c.bf16 %v8768_v60, %v8765_v15  ;;  %v2247_v38 = vld [vmem:[%s9942_s3] sm:$0xff]  ;;  %v8955_v15 = vld [vmem:[%s9942_s3 + $0x50] sm:$0xff] }
  0x47   :  { %7749 = vmatprep.subr.bf16.mxu1 %v8786_v32  ;;  %1349 = vmatprep.mubr.f32.mxu0 %v8283_v3  ;;  %v2284_v49 = vand.u32 4294901760, %v2247_v38  ;;  %v7734_v57 = vpack.c.bf16 %v1289_v26, %v1277_v41  ;;  %v2296_v41 = vand.u32 4294901760, %v2271_v1  ;;  %v2250_v26 = vld [vmem:[%s9942_s3 + $0x18] sm:$0xff]  ;;  %v7778_v45 = vpack.c.bf16 %v1808_v47, %v1796_v29 }
  0x48   :  { %1776 = vmatprep.mubr.f32.mxu1 %v8283_v3  ;;  %v7782_v54 = vpack.c.bf16 %v1832_v18, %v1820_v7  ;;  %v2825_v29 = vand.u32 4294901760, %v2250_v26 }
  0x49   :  { %7711 = vmatpush1.bf16.msra.mxu0 %v7710_v55  ;;  %v7764_v55 = vpack.c.bf16 %v8747_v28, %v8744_v42  ;;  %v8905_v5 = vsub.f32 %v2247_v38, %v2284_v49  ;;  %v2829_v42 = vand.u32 4294901760, %v2258_v22  ;;  %v8940_v28 = vpack.c.bf16 %v2288_v56, %v2284_v49 }
  0x4a   :  { %7751 = vmatpush1.bf16.msra.mxu1 %v8806_v58  ;;  %7713 = vmatprep.subr.bf16.mxu0 %v7712_v44  ;;  %v2248_v44 = vld [vmem:[%s9942_s3 + $0x8] sm:$0xff]  ;;  %v8989_v38 = vsub.f32 %v2250_v26, %v2825_v29 }
  0x4b   :  { %7753 = vmatprep.subr.bf16.mxu1 %v7752_v0  ;;  %v2282_v62 = vand.u32 4294901760, %v2248_v44  ;;  %v2286_v0 = vand.u32 4294901760, %v2256_v59 }
  0x4c   :  { %1351 = vmatmul.mubr.f32.vlgmr.msra.gmra.mrb[2].mxu0 %v8407_v34 }
  0x4d   :  { %1782 = vmatmul.mubr.f32.vlgmr.msra.gmra.mrb[4].mxu1 %v8467_v8  ;;  %7715 = vmatpush1.bf16.msra.mxu0 %v7714_v30  ;;  %v8882_v52 = vsub.f32 %v2248_v44, %v2282_v62  ;;  %v8884_v33 = vsub.f32 %v2256_v59, %v2286_v0  ;;  %v2290_v30 = vand.u32 4294901760, %v2264_v48  ;;  %v8938_v27 = vpack.c.bf16 %v2286_v0, %v2282_v62  ;;  %v8976_v44 = vld [vmem:[%s9942_s3 + $0xd8] sm:$0xff] }
  0x4e   :  { %7755 = vmatpush1.bf16.msra.mxu1 %v7754_v13  ;;  %7717 = vmatprep.subr.bf16.mxu0 %v7716_v40  ;;  %v2294_v13 = vand.u32 4294901760, %v2272_v39  ;;  %v2280_v40 = vsel %vm71_vm0, %v37_v11, 0  ;;  %v8980_v59 = vsub.f32 %v2263_v10, %v2292_v9  ;;  %v8987_v0 = vpack.c.bf16 %v2829_v42, %v2825_v29  ;;  %v9009_v11 = vld [vmem:[%s9942_s3 + $0xd0] sm:$0xff] }
  0x4f   :  { %7757 = vmatprep.subr.bf16.mxu1 %v7756_v25  ;;  %1437 = vmatprep.mubr.f32.mxu0 %v8283_v3  ;;  %v8914_v25 = vsub.f32 %v2255_v37, %v2288_v56  ;;  %v8916_v21 = vand.u32 4294901760, %v2280_v40  ;;  %v2368_v19 = vand.u32 4294901760, %v8882_v52  ;;  %v2380_v50 = vand.u32 4294901760, %v8884_v33 }
  0x50   :  { %1892 = vmatprep.mubr.f32.mxu1 %v8283_v3  ;;  %v8942_v47 = vpack.c.bf16 %v2294_v13, %v2290_v30  ;;  %v2831_v37 = vand.u32 4294901760, %v8955_v15 }
  0x51   :  { %7719 = vmatpush1.bf16.msra.mxu0 %v7718_v20  ;;  %v7780_v20 = vpack.c.bf16 %v1826_v24, %v1814_v63  ;;  %v8944_v63 = vpack.c.bf16 %v2296_v41, %v2292_v9  ;;  %v2374_v24 = vand.u32 4294901760, %v8905_v5  ;;  %v8959_v60 = vsub.f32 %v2280_v40, %v8916_v21 }
  0x52   :  { %7759 = vmatpush1.bf16.msra.mxu1 %v7758_v23  ;;  %7721 = vmatprep.subr.bf16.mxu0 %v8648_v61  ;;  %v8928_v23 = vsub.f32 %v2264_v48, %v2290_v30  ;;  %v2369_v7 = vsub.f32 %v8882_v52, %v2368_v19  ;;  %v2381_v18 = vsub.f32 %v8884_v33, %v2380_v50 }
  0x53   :  { %7761 = vmatprep.subr.bf16.mxu1 %v7760_v46  ;;  %v8930_v46 = vsub.f32 %v2272_v39, %v2294_v13  ;;  %v9004_v39 = vld [vmem:[%s9942_s3 + $0x90] sm:$0xff]  ;;  %v9013_v49 = vand.u32 4294901760, %v8959_v60  ;;  %v9953_v13 = vand.u32 4294901760, %v8980_v59 }
  0x54   :  { %1440 = vmatmul.mubr.f32.vlgmr.msra.gmra.mrb[2].mxu0 %v8419_v43  ;;  %v2370_v56 = vand.u32 4294901760, %v2369_v7  ;;  %v2382_v10 = vand.u32 4294901760, %v2381_v18  ;;  %v2835_v9 = vand.u32 4294901760, %v9004_v39 }
  0x55   :  { %1894 = vmatmul.mubr.f32.vlgmr.msra.gmra.mrb[4].mxu1 %v8407_v34  ;;  %7723 = vmatpush1.bf16.msra.mxu0 %v8650_v2  ;;  %v2404_v62 = vand.u32 4294901760, %v8930_v46  ;;  %v2399_v7 = vsub.f32 %v8980_v59, %v9953_v13 }
  0x56   :  { %7763 = vmatpush1.bf16.msra.mxu1 %v7762_v35  ;;  %7725 = vmatprep.subr.bf16.mxu0 %v8692_v4  ;;  %v2386_v35 = vand.u32 4294901760, %v8914_v25  ;;  %v7800_v29 = vpack.c.bf16 %v2382_v10, %v2370_v56 }
  0x57   :  { %7765 = vmatprep.subr.bf16.mxu1 %v7764_v55  ;;  %1518 = vmatprep.mubr.f32.mxu0 %v8283_v3  ;;  %v8971_v55 = vld [vmem:[%s9942_s3 + $0x98] sm:$0xff]  ;;  %v2405_v30 = vsub.f32 %v8930_v46, %v2404_v62 }
  0x58   :  { %1980 = vmatprep.mubr.f32.mxu1 %v8283_v3  ;;  %v2833_v48 = vand.u32 4294901760, %v8971_v55 }
  0x59   :  { %7727 = vmatpush1.bf16.msra.mxu0 %v8694_v6 }
  0x5a   :  { %7767 = vmatpush1.bf16.msra.mxu1 %v7766_v12  ;;  %7729 = vmatprep.subr.bf16.mxu0 %v7728_v14  ;;  %v8982_v12 = vsub.f32 %v2271_v1, %v2296_v41  ;;  %v2392_v14 = vand.u32 4294901760, %v8928_v23  ;;  %v2387_v1 = vsub.f32 %v8914_v25, %v2386_v35  ;;  %v2839_v41 = vand.u32 4294901760, %v9009_v11 }
  0x5b   :  { %7769 = vmatprep.subr.bf16.mxu1 %v8752_v53  ;;  %v9038_v26 = vsub.f32 %v8971_v55, %v2833_v48  ;;  %v9059_v55 = vsub.f32 %v9004_v39, %v2835_v9 }
  0x5c   :  { %1522 = vmatmul.mubr.f32.vlgmr.msra.gmra.mrb[2].mxu0 %v8439_v51  ;;  %v9951_v40 = vand.u32 4294901760, %v8982_v12 }
  0x5d   :  { %1983 = vmatmul.mubr.f32.vlgmr.msra.gmra.mrb[4].mxu1 %v8419_v43  ;;  %7731 = vmatpush1.bf16.msra.mxu0 %v7730_v36  ;;  %v2935_v10 = vand.u32 4294901760, %v9038_v26 }
  0x5e   :  { %7771 = vmatpush1.bf16.msra.mxu1 %v8783_v31  ;;  %7733 = vmatprep.subr.bf16.mxu0 %v7732_v17  ;;  %v2375_v17 = vsub.f32 %v8905_v5, %v2374_v24  ;;  %v2411_v18 = vsub.f32 %v8982_v12, %v9951_v40 }
  0x5f   :  { %7773 = vmatprep.subr.bf16.mxu1 %v8786_v32  ;;  %1616 = vmatprep.mubr.f32.mxu0 %v8283_v3 }
  0x60   :  { %2061 = vmatprep.mubr.f32.mxu1 %v8283_v3  ;;  %v2412_v13 = vand.u32 4294901760, %v2411_v18 }
  0x61   :  { %7735 = vmatpush1.bf16.msra.mxu0 %v7734_v57  ;;  %v2393_v57 = vsub.f32 %v8928_v23, %v2392_v14 }
  0x62   :  { %7775 = vmatpush1.bf16.msra.mxu1 %v8806_v58  ;;  %7737 = vmatprep.subr.bf16.mxu0 %v8648_v61  ;;  %v8950_v61 = vld [vmem:[%s9942_s3 + $0x10] sm:$0xff] }
  0x63   :  { %7777 = vmatprep.subr.bf16.mxu1 %v7776_v16  ;;  %v2827_v36 = vand.u32 4294901760, %v8950_v61 }
  0x64   :  { %1618 = vmatmul.mubr.f32.vlgmr.msra.gmra.mrb[2].mxu0 %v8407_v34 }
  0x65   :  { %2065 = vmatmul.mubr.f32.vlgmr.msra.gmra.mrb[4].mxu1 %v8439_v51  ;;  %7739 = vmatpush1.bf16.msra.mxu0 %v8650_v2  ;;  %v8994_v2 = vsub.f32 %v2258_v22, %v2829_v42  ;;  %v9029_v16 = vsub.f32 %v8950_v61, %v2827_v36  ;;  %v2376_v42 = vand.u32 4294901760, %v2375_v17  ;;  %v2388_v61 = vand.u32 4294901760, %v2387_v1 }
  0x66   :  { %7779 = vmatpush1.bf16.msra.mxu1 %v7778_v45  ;;  %7741 = vmatprep.subr.bf16.mxu0 %v8692_v4  ;;  %v2837_v4 = vand.u32 4294901760, %v8976_v44  ;;  %v9952_v45 = vand.u32 4294901760, %v8989_v38 }
  0x67   :  { %7781 = vmatprep.subr.bf16.mxu1 %v7780_v20  ;;  %1696 = vmatprep.mubr.f32.mxu0 %v8283_v3  ;;  %v9954_v20 = vand.u32 4294901760, %v8994_v2  ;;  %v2917_v17 = vand.u32 4294901760, %v9029_v16 }
  0x68   :  { %2159 = vmatprep.mubr.f32.mxu1 %v8283_v3  ;;  %v9041_v22 = vsub.f32 %v8976_v44, %v2837_v4  ;;  %v9062_v44 = vsub.f32 %v9009_v11, %v2839_v41  ;;  %v9082_v40 = vpack.c.bf16 %v2837_v4, %v2833_v48 }
  0x69   :  { %7743 = vmatpush1.bf16.msra.mxu0 %v8694_v6  ;;  %v9032_v6 = vsub.f32 %v8955_v15, %v2831_v37  ;;  %v2406_v15 = vand.u32 4294901760, %v2405_v30  ;;  %v2924_v39 = vsub.f32 %v8994_v2, %v9954_v20  ;;  %v2918_v20 = vsub.f32 %v9029_v16, %v2917_v17 }
  0x6a   :  { %7783 = vmatpush1.bf16.msra.mxu1 %v7782_v54  ;;  %7793 = vmatprep.subr.bf16.mxu0 %v8938_v27  ;;  %v2358_v54 = vsub.f32 %v8959_v60, %v9013_v49  ;;  %v2947_v11 = vand.u32 4294901760, %v9041_v22 }
  0x6b   :  { %7785 = vmatprep.subr.bf16.mxu1 %v8752_v53  ;;  %v2394_v53 = vand.u32 4294901760, %v2393_v57  ;;  %v2929_v56 = vand.u32 4294901760, %v9032_v6  ;;  %v7802_v57 = vpack.c.bf16 %v2388_v61, %v2376_v42  ;;  %v2925_v4 = vand.u32 4294901760, %v2924_v39 }
  0x6c   :  { %1698 = vmatmul.mubr.f32.vlgmr.msra.gmra.mrb[2].mxu0 %v8407_v34  ;;  %v9077_v1 = vand.u32 4294901760, %v2358_v54  ;;  %v9102_v61 = vpack.c.bf16 %v2839_v41, %v2835_v9  ;;  %v7812_v39 = vpack.c.bf16 %v8930_v46, %v8928_v23  ;;  %v9959_v46 = vand.u32 4294901760, %v8980_v59 }
  0x6d   :  { %2161 = vmatmul.mubr.f32.vlgmr.msra.gmra.mrb[4].mxu1 %v8407_v34  ;;  %7795 = vmatpush1.bf16.msra.mxu0 %v8940_v28  ;;  %v7804_v30 = vpack.c.bf16 %v2406_v15, %v2394_v53  ;;  %v2930_v54 = vsub.f32 %v9032_v6, %v2929_v56  ;;  %v7808_v53 = vpack.c.bf16 %v8884_v33, %v8882_v52  ;;  %v2919_v15 = vand.u32 4294901760, %v2918_v20  ;;  %v2251_v52 = vld [vmem:[%s9942_s3 + $0x20] sm:$0xff] }
  0x6e   :  { %7787 = vmatpush1.bf16.msra.mxu1 %v8783_v31  ;;  %7797 = vmatprep.subr.bf16.mxu0 %v8942_v47  ;;  %v2912_v31 = vsub.f32 %v8989_v38, %v9952_v45  ;;  %v2400_v45 = vand.u32 4294901760, %v2399_v7  ;;  %v2259_v33 = vld [vmem:[%s9942_s3 + $0x60] sm:$0xff]  ;;  %v3370_v23 = vand.u32 4294901760, %v2251_v52 }
  0x6f   :  { %7789 = vmatprep.subr.bf16.mxu1 %v8786_v32  ;;  %2239 = vmatprep.mubr.f32.mxu1 %v8283_v3  ;;  %v9079_v32 = vpack.c.bf16 %v2831_v37, %v2827_v36  ;;  %v2941_v36 = vand.u32 4294901760, %v9059_v55  ;;  %v2953_v37 = vand.u32 4294901760, %v9062_v44  ;;  %v2931_v7 = vand.u32 4294901760, %v2930_v54 }
  0x70   :  { %2354 = vmatprep.mubr.f32.mxu0 %v8283_v3  ;;  %v2913_v48 = vand.u32 4294901760, %v2912_v31  ;;  %v7806_v42 = vpack.c.bf16 %v2412_v13, %v2400_v45  ;;  %v7810_v45 = vpack.c.bf16 %v8914_v25, %v8905_v5  ;;  %v2268_v5 = vld [vmem:[%s9942_s3 + $0xa8] sm:$0xff] }
  0x71   :  { %7799 = vmatpush1.bf16.msra.mxu0 %v8944_v63  ;;  %v2942_v18 = vsub.f32 %v9059_v55, %v2941_v36  ;;  %v2954_v31 = vsub.f32 %v9062_v44, %v2953_v37  ;;  %v7850_v20 = vpack.c.bf16 %v2931_v7, %v2919_v15  ;;  %v2260_v15 = vld [vmem:[%s9942_s3 + $0x68] sm:$0xff]  ;;  %v7862_v7 = vpack.c.bf16 %v9062_v44, %v9059_v55 }
  0x72   :  { %7791 = vmatpush1.bf16.msra.mxu1 %v8806_v58  ;;  %7801 = vmatprep.subr.bf16.mxu0 %v7800_v29  ;;  %v2936_v58 = vsub.f32 %v9038_v26, %v2935_v10  ;;  %v2948_v29 = vsub.f32 %v9041_v22, %v2947_v11  ;;  %v7848_v13 = vpack.c.bf16 %v2925_v4, %v2913_v48  ;;  %v2276_v25 = vld [vmem:[%s9942_s3 + $0xe8] sm:$0xff] }
  0x73   :  { %7841 = vmatprep.subr.bf16.mxu1 %v8987_v0  ;;  %v7814_v48 = vpack.c.bf16 %v8982_v12, %v8980_v59  ;;  %v9961_v59 = vand.u32 4294901760, %v8989_v38 }
  0x74   :  { %2360 = vmatmul.mubr.f32.vlgmr.msra.gmra.mrb[4].mxu0 %v9077_v1  ;;  %v2937_v9 = vand.u32 4294901760, %v2936_v58  ;;  %v2949_v41 = vand.u32 4294901760, %v2948_v29  ;;  %v7856_v58 = vpack.c.bf16 %v8994_v2, %v8989_v38  ;;  %v7858_v29 = vpack.c.bf16 %v9032_v6, %v9029_v16  ;;  %v9212_v38 = vld [vmem:[%s9942_s3 + $0x78] sm:$0xff]  ;;  %v9241_v6 = vld [vmem:[%s9942_s3 + $0x30] sm:$0xff] }
  0x75   :  { %2241 = vmatmul.mubr.f32.vlgmr.msra.gmra.mrb[4].mxu1 %v8407_v34  ;;  %7803 = vmatpush1.bf16.msra.mxu0 %v7802_v57  ;;  %v2943_v57 = vand.u32 4294901760, %v2942_v18  ;;  %v7824_v18 = vpack.c.bf16 %v2380_v50, %v2368_v19  ;;  %v7828_v19 = vpack.c.bf16 %v2404_v62, %v2392_v14  ;;  %v9960_v14 = vand.u32 4294901760, %v8982_v12 }
  0x76   :  { %7843 = vmatpush1.bf16.msra.mxu1 %v9079_v32  ;;  %7805 = vmatprep.subr.bf16.mxu0 %v7804_v30  ;;  %v2955_v30 = vand.u32 4294901760, %v2954_v31  ;;  %v7852_v54 = vpack.c.bf16 %v2949_v41, %v2937_v9  ;;  %v7826_v9 = vpack.c.bf16 %v2386_v35, %v2374_v24  ;;  %v3374_v35 = vand.u32 4294901760, %v2259_v33 }
  0x77   :  { %7845 = vmatprep.subr.bf16.mxu1 %v9082_v40  ;;  %2470 = vmatprep.mubr.f32.mxu0 %v8283_v3  ;;  %v7830_v62 = vpack.c.bf16 %v9960_v14, %v9959_v46  ;;  %v3376_v41 = vand.u32 4294901760, %v2268_v5  ;;  %v9962_v12 = vand.u32 4294901760, %v8994_v2  ;;  %v3915_v16 = vand.u32 4294901760, %v9212_v38  ;;  %v9299_v46 = vld [vmem:[%s9942_s3 + $0xf0] sm:$0xff] }
  0x78   :  { %2897 = vmatprep.mubr.f32.mxu1 %v8283_v3  ;;  %v7854_v4 = vpack.c.bf16 %v2955_v30, %v2943_v57  ;;  %v9198_v30 = vsub.f32 %v2251_v52, %v3370_v23  ;;  %v9234_v52 = vpack.c.bf16 %v3374_v35, %v3370_v23 }
  0x79   :  { %7807 = vmatpush1.bf16.msra.mxu0 %v7806_v42  ;;  %v7860_v42 = vpack.c.bf16 %v9041_v22, %v9038_v26  ;;  %v7872_v57 = vpack.c.bf16 %v9962_v12, %v9961_v59  ;;  %v9214_v2 = vsub.f32 %v2268_v5, %v3376_v41  ;;  %v9246_v26 = vld [vmem:[%s9942_s3 + $0x70] sm:$0xff] }
  0x7a   :  { %7847 = vmatpush1.bf16.msra.mxu1 %v9102_v61  ;;  %7809 = vmatprep.subr.bf16.mxu0 %v7808_v53  ;;  %v2252_v53 = vld [vmem:[%s9942_s3 + $0x28] sm:$0xff]  ;;  %v3460_v44 = vand.u32 4294901760, %v9198_v30  ;;  %v3917_v5 = vand.u32 4294901760, %v9246_v26 }
  0x7b   :  { %7849 = vmatprep.subr.bf16.mxu1 %v7848_v13  ;;  %v3368_v31 = vand.u32 4294901760, %v2252_v53  ;;  %v3372_v13 = vand.u32 4294901760, %v2260_v15 }
  0x7c   :  { %2472 = vmatmul.mubr.f32.vlgmr.msra.gmra.mrb[4].mxu0 %v8916_v21 }
  0x7d   :  { %2903 = vmatmul.mubr.f32.vlgmr.msra.gmra.mrb[6].mxu1 %v9077_v1  ;;  %7811 = vmatpush1.bf16.msra.mxu0 %v7810_v45  ;;  %v9175_v50 = vsub.f32 %v2252_v53, %v3368_v31  ;;  %v9177_v24 = vsub.f32 %v2260_v15, %v3372_v13  ;;  %v3380_v45 = vand.u32 4294901760, %v2276_v25  ;;  %v7874_v15 = vpack.c.bf16 %v2929_v56, %v2917_v17  ;;  %v9260_v56 = vld [vmem:[%s9942_s3 + $0xb8] sm:$0xff] }
  0x7e   :  { %7851 = vmatpush1.bf16.msra.mxu1 %v7850_v20  ;;  %7813 = vmatprep.subr.bf16.mxu0 %v7812_v39  ;;  %v2267_v20 = vld [vmem:[%s9942_s3 + $0xa0] sm:$0xff]  ;;  %v3919_v23 = vand.u32 4294901760, %v9260_v56 }
  0x7f   :  { %7853 = vmatprep.subr.bf16.mxu1 %v7852_v54  ;;  %2558 = vmatprep.mubr.f32.mxu0 %v8283_v3  ;;  %v2275_v39 = vld [vmem:[%s9942_s3 + $0xe0] sm:$0xff]  ;;  %v9200_v54 = vsub.f32 %v2259_v33, %v3374_v35  ;;  %v9294_v35 = vld [vmem:[%s9942_s3 + $0xb0] sm:$0xff] }
  0x80   :  { %3013 = vmatprep.mubr.f32.mxu1 %v8283_v3  ;;  %v3382_v53 = vand.u32 4294901760, %v2275_v39 }
  0x81   :  { %7815 = vmatpush1.bf16.msra.mxu0 %v7814_v48  ;;  %v3454_v48 = vand.u32 4294901760, %v9175_v50  ;;  %v3472_v17 = vand.u32 4294901760, %v9200_v54 }
  0x82   :  { %7855 = vmatpush1.bf16.msra.mxu1 %v7854_v4  ;;  %7817 = vmatprep.subr.bf16.mxu0 %v8938_v27  ;;  %v3466_v4 = vand.u32 4294901760, %v9177_v24 }
  0x83   :  { %7857 = vmatprep.subr.bf16.mxu1 %v7856_v58  ;;  %v9207_v58 = vld [vmem:[%s9942_s3 + $0x38] sm:$0xff]  ;;  %v3455_v22 = vsub.f32 %v9175_v50, %v3454_v48 }
  0x84   :  { %2561 = vmatmul.mubr.f32.vlgmr.msra.gmra.mrb[4].mxu0 %v8959_v60  ;;  %v3467_v55 = vsub.f32 %v9177_v24, %v3466_v4 }
  0x85   :  { %3015 = vmatmul.mubr.f32.vlgmr.msra.gmra.mrb[6].mxu1 %v8916_v21  ;;  %7819 = vmatpush1.bf16.msra.mxu0 %v8940_v28  ;;  %v3456_v14 = vand.u32 4294901760, %v3455_v22 }
  0x86   :  { %7859 = vmatpush1.bf16.msra.mxu1 %v7858_v29  ;;  %7821 = vmatprep.subr.bf16.mxu0 %v8942_v47  ;;  %v9216_v29 = vsub.f32 %v2276_v25, %v3380_v45  ;;  %v9287_v25 = vsub.f32 %v9212_v38, %v3915_v16  ;;  %v3925_v38 = vand.u32 4294901760, %v9299_v46 }
  0x87   :  { %7861 = vmatprep.subr.bf16.mxu1 %v7860_v42  ;;  %2639 = vmatprep.mubr.f32.mxu0 %v8283_v3  ;;  %v3378_v42 = vand.u32 4294901760, %v2267_v20 }
  0x88   :  { %3101 = vmatprep.mubr.f32.mxu1 %v8283_v3 }
  0x89   :  { %7823 = vmatpush1.bf16.msra.mxu0 %v8944_v63  ;;  %v9278_v33 = vpack.c.bf16 %v3382_v53, %v3378_v42 }
  0x8a   :  { %7863 = vmatpush1.bf16.msra.mxu1 %v7862_v7  ;;  %7825 = vmatprep.subr.bf16.mxu0 %v7824_v18  ;;  %v7876_v7 = vpack.c.bf16 %v2947_v11, %v2935_v10  ;;  %v7878_v18 = vpack.c.bf16 %v2953_v37, %v2941_v36  ;;  %v9265_v10 = vld [vmem:[%s9942_s3 + $0xf8] sm:$0xff]  ;;  %v9269_v11 = vsub.f32 %v2267_v20, %v3378_v42  ;;  %v3478_v37 = vand.u32 4294901760, %v9214_v2  ;;  %s8287_s3 = smov 80  }
  0x8b   :  { %7865 = vmatprep.subr.bf16.mxu1 %v8987_v0  ;;  %v9271_v36 = vsub.f32 %v2275_v39, %v3382_v53  ;;  %v9328_v42 = vsub.f32 %v9260_v56, %v3919_v23 }
  0x8c   :  { %2643 = vmatmul.mubr.f32.vlgmr.msra.gmra.mrb[4].mxu0 %v9013_v49  ;;  %v3479_v20 = vsub.f32 %v9214_v2, %v3478_v37  ;;  %v3484_v59 = vand.u32 4294901760, %v9269_v11 }
  0x8d   :  { %3104 = vmatmul.mubr.f32.vlgmr.msra.gmra.mrb[6].mxu1 %v8959_v60  ;;  %7827 = vmatpush1.bf16.msra.mxu0 %v7826_v9  ;;  %v9232_v9 = vpack.c.bf16 %v3372_v13, %v3368_v31  ;;  %v3490_v31 = vand.u32 4294901760, %v9216_v29  ;;  %v9276_v13 = vpack.c.bf16 %v3380_v45, %v3376_v41  ;;  %v3461_v41 = vsub.f32 %v9198_v30, %v3460_v44 }
  0x8e   :  { %7867 = vmatpush1.bf16.msra.mxu1 %v9079_v32  ;;  %7829 = vmatprep.subr.bf16.mxu0 %v7828_v19  ;;  %v3913_v19 = vand.u32 4294901760, %v9241_v6  ;;  %v3473_v45 = vsub.f32 %v9200_v54, %v3472_v17  ;;  %v9955_v12 = vand.u32 4294901760, %v9271_v36  ;;  %v3485_v56 = vsub.f32 %v9269_v11, %v3484_v59 }
  0x8f   :  { %7869 = vmatprep.subr.bf16.mxu1 %v9082_v40  ;;  %2737 = vmatprep.mubr.f32.mxu0 %v8283_v3  ;;  %v3491_v39 = vsub.f32 %v9216_v29, %v3490_v31 }
  0x90   :  { %3182 = vmatprep.mubr.f32.mxu1 %v8283_v3  ;;  %v3474_v22 = vand.u32 4294901760, %v3473_v45 }
  0x91   :  { %7831 = vmatpush1.bf16.msra.mxu0 %v7830_v62  ;;  %v3468_v62 = vand.u32 4294901760, %v3467_v55  ;;  %v3492_v55 = vand.u32 4294901760, %v3491_v39 }
  0x92   :  { %7871 = vmatpush1.bf16.msra.mxu1 %v9102_v61  ;;  %7833 = vmatprep.subr.bf16.mxu0 %v8938_v27  ;;  %v3911_v27 = vand.u32 4294901760, %v9207_v58 }
  0x93   :  { %7873 = vmatprep.subr.bf16.mxu1 %v7872_v57  ;;  %v9319_v57 = vsub.f32 %v9241_v6, %v3913_v19 }
  0x94   :  { %2739 = vmatmul.mubr.f32.vlgmr.msra.gmra.mrb[4].mxu0 %v8916_v21  ;;  %v9336_v6 = vpack.c.bf16 %v3915_v16, %v3911_v27  ;;  %v9352_v16 = vsub.f32 %v9299_v46, %v3925_v38 }
  0x95   :  { %3186 = vmatmul.mubr.f32.vlgmr.msra.gmra.mrb[6].mxu1 %v9013_v49  ;;  %7835 = vmatpush1.bf16.msra.mxu0 %v8940_v28  ;;  %v9284_v28 = vsub.f32 %v9207_v58, %v3911_v27  ;;  %v3921_v58 = vand.u32 4294901760, %v9294_v35 }
  0x96   :  { %7875 = vmatpush1.bf16.msra.mxu1 %v7874_v15  ;;  %7837 = vmatprep.subr.bf16.mxu0 %v8942_v47  ;;  %v3923_v47 = vand.u32 4294901760, %v9265_v10 }
  0x97   :  { %7877 = vmatprep.subr.bf16.mxu1 %v7876_v7  ;;  %2817 = vmatprep.mubr.f32.mxu0 %v8283_v3  ;;  %v9956_v15 = vand.u32 4294901760, %v9284_v28  ;;  %v9957_v7 = vand.u32 4294901760, %v9287_v25  ;;  %v9349_v27 = vsub.f32 %v9294_v35, %v3921_v58 }
  0x98   :  { %3280 = vmatprep.mubr.f32.mxu1 %v8283_v3  ;;  %v9331_v53 = vsub.f32 %v9265_v10, %v3923_v47  ;;  %v3497_v10 = vsub.f32 %v9271_v36, %v9955_v12  ;;  %v9370_v39 = vpack.c.bf16 %v3923_v47, %v3919_v23  ;;  %v3486_v12 = vand.u32 4294901760, %v3485_v56 }
  0x99   :  { %7839 = vmatpush1.bf16.msra.mxu0 %v8944_v63  ;;  %v9322_v63 = vsub.f32 %v9246_v26, %v3917_v5  ;;  %v3462_v26 = vand.u32 4294901760, %v3461_v41  ;;  %v4010_v35 = vsub.f32 %v9287_v25, %v9957_v7  ;;  %v4021_v41 = vand.u32 4294901760, %v9328_v42 }
  0x9a   :  { %7879 = vmatpush1.bf16.msra.mxu1 %v7878_v18  ;;  %7889 = vmatprep.subr.bf16.mxu0 %v9232_v9  ;;  %v7896_v18 = vpack.c.bf16 %v3468_v62, %v3456_v14  ;;  %v4003_v14 = vand.u32 4294901760, %v9319_v57  ;;  %v4033_v46 = vand.u32 4294901760, %v9331_v53 }
  0x9b   :  { %7881 = vmatprep.subr.bf16.mxu1 %v8987_v0  ;;  %v3480_v0 = vand.u32 4294901760, %v3479_v20  ;;  %v4015_v62 = vand.u32 4294901760, %v9322_v63  ;;  %v7898_v45 = vpack.c.bf16 %v3474_v22, %v3462_v26  ;;  %v9367_v20 = vpack.c.bf16 %v3917_v5, %v3913_v19 }
  0x9c   :  { %2819 = vmatmul.mubr.f32.vlgmr.msra.gmra.mrb[4].mxu0 %v8916_v21  ;;  %v4004_v7 = vsub.f32 %v9319_v57, %v4003_v14  ;;  %v4027_v19 = vand.u32 4294901760, %v9349_v27  ;;  %v9958_v5 = vand.u32 4294901760, %v9352_v16  ;;  %v4011_v47 = vand.u32 4294901760, %v4010_v35 }
  0x9d   :  { %3282 = vmatmul.mubr.f32.vlgmr.msra.gmra.mrb[6].mxu1 %v8916_v21  ;;  %7891 = vmatpush1.bf16.msra.mxu0 %v9234_v52  ;;  %v4016_v26 = vsub.f32 %v9322_v63, %v4015_v62 }
  0x9e   :  { %7883 = vmatpush1.bf16.msra.mxu1 %v9079_v32  ;;  %7893 = vmatprep.subr.bf16.mxu0 %v9276_v13  ;;  %v3998_v32 = vsub.f32 %v9284_v28, %v9956_v15  ;;  %v3498_v15 = vand.u32 4294901760, %v3497_v10  ;;  %v4005_v56 = vand.u32 4294901760, %v4004_v7  ;;  %v4040_v35 = vsub.f32 %v9352_v16, %v9958_v5 }
  0x9f   :  { %7885 = vmatprep.subr.bf16.mxu1 %v9082_v40  ;;  %3360 = vmatprep.mubr.f32.mxu1 %v8283_v3  ;;  %v7900_v40 = vpack.c.bf16 %v3492_v55, %v3480_v0  ;;  %v9390_v0 = vpack.c.bf16 %v3925_v38, %v3921_v58  ;;  %v7904_v55 = vpack.c.bf16 %v9177_v24, %v9175_v50  ;;  %v4017_v10 = vand.u32 4294901760, %v4016_v26  ;;  %v4602_v24 = vld [vmem:[%s9944_s6] sm:$0xff] }
  0xa0   :  { %3440 = vmatprep.mubr.f32.mxu0 %v8283_v3  ;;  %v3999_v23 = vand.u32 4294901760, %v3998_v32  ;;  %v7902_v22 = vpack.c.bf16 %v3498_v15, %v3486_v12  ;;  %v4028_v32 = vsub.f32 %v9349_v27, %v4027_v19  ;;  %v7906_v15 = vpack.c.bf16 %v9200_v54, %v9198_v30  ;;  %v4603_v30 = vld [vmem:[%s9944_s6 + $0x8] sm:$0xff] }
  0xa1   :  { %7895 = vmatpush1.bf16.msra.mxu0 %v9278_v33  ;;  %v7946_v7 = vpack.c.bf16 %v4017_v10, %v4005_v56  ;;  %v4041_v26 = vand.u32 4294901760, %v4040_v35  ;;  %v7922_v56 = vpack.c.bf16 %v3472_v17, %v3460_v44  ;;  %v7924_v50 = vpack.c.bf16 %v3490_v31, %v3478_v37 }
  0xa2   :  { %7887 = vmatpush1.bf16.msra.mxu1 %v9102_v61  ;;  %7897 = vmatprep.subr.bf16.mxu0 %v7896_v18  ;;  %v4022_v61 = vsub.f32 %v9328_v42, %v4021_v41  ;;  %v4034_v18 = vsub.f32 %v9331_v53, %v4033_v46  ;;  %v7944_v12 = vpack.c.bf16 %v4011_v47, %v3999_v23  ;;  %v9963_v54 = vand.u32 4294901760, %v9271_v36 }
  0xa3   :  { %7937 = vmatprep.subr.bf16.mxu1 %v9336_v6  ;;  %v7910_v23 = vpack.c.bf16 %v9271_v36, %v9269_v11  ;;  %v9964_v44 = vand.u32 4294901760, %v9284_v28  ;;  %v9965_v17 = vand.u32 4294901760, %v9287_v25  ;;  %v4605_v36 = vld [vmem:[%s9944_s6 + $0x18] sm:$0xff]  ;;  %v7970_v31 = vpack.c.bf16 %v4015_v62, %v4003_v14 }
  0xa4   :  { %3446 = vmatmul.mubr.f32.vlgmr.msra.gmra.mrb[6].mxu0 %v9077_v1  ;;  %v4023_v58 = vand.u32 4294901760, %v4022_v61  ;;  %v4035_v38 = vand.u32 4294901760, %v4034_v18  ;;  %v7952_v61 = vpack.c.bf16 %v9287_v25, %v9284_v28  ;;  %v7954_v18 = vpack.c.bf16 %v9322_v63, %v9319_v57 }
  0xa5   :  { %3362 = vmatmul.mubr.f32.vlgmr.msra.gmra.mrb[6].mxu1 %v8916_v21  ;;  %7899 = vmatpush1.bf16.msra.mxu0 %v7898_v45  ;;  %v7908_v45 = vpack.c.bf16 %v9216_v29, %v9214_v2  ;;  %v4610_v2 = vand.u32 4294901760, %v4603_v30  ;;  %v4604_v29 = vld [vmem:[%s9944_s6 + $0x10] sm:$0xff]  ;;  %v7968_v11 = vpack.c.bf16 %v9965_v17, %v9964_v44  ;;  %v7972_v10 = vpack.c.bf16 %v4033_v46, %v4021_v41  ;;  %v9518_v46 = vld [vmem:[%s9945_s5 + $0x8] sm:$0xff] }
  0xa6   :  { %7939 = vmatpush1.bf16.msra.mxu1 %v9367_v20  ;;  %7901 = vmatprep.subr.bf16.mxu0 %v7900_v40  ;;  %v4029_v40 = vand.u32 4294901760, %v4028_v32  ;;  %v7948_v5 = vpack.c.bf16 %v4035_v38, %v4023_v58  ;;  %v4613_v37 = vand.u32 4294901760, %v4604_v29  ;;  %v9966_v57 = vand.u32 4294901760, %v9352_v16 }
  0xa7   :  { %7941 = vmatprep.subr.bf16.mxu1 %v9370_v39  ;;  %3556 = vmatprep.mubr.f32.mxu0 %v8283_v3  ;;  %v9478_v25 = vsub.f32 %v4603_v30, %v4610_v2  ;;  %v5095_v38 = vand.u32 4294901760, %v9518_v46 }
  0xa8   :  { %3983 = vmatprep.mubr.f32.mxu1 %v8283_v3  ;;  %v7950_v47 = vpack.c.bf16 %v4041_v26, %v4029_v40  ;;  %v7974_v63 = vpack.c.bf16 %v9966_v57, %v4027_v19  ;;  %v8220_v57 = vld [vmem:[%s9946_s4 + $0x8] sm:$0xff]  }
  0xa9   :  { %7903 = vmatpush1.bf16.msra.mxu0 %v7902_v22  ;;  %v7956_v22 = vpack.c.bf16 %v9331_v53, %v9328_v42  ;;  %v4695_v14 = vand.u32 4294901760, %v9478_v25  ;;  %v9549_v26 = vsub.f32 %v9518_v46, %v5095_v38  ;;  %v8233_v46 = vld [vmem:[%s9946_s4 + $0x68] sm:$0xff]  }
  0xaa   :  { %7943 = vmatpush1.bf16.msra.mxu1 %v9390_v0  ;;  %7905 = vmatprep.subr.bf16.mxu0 %v7904_v55  ;;  %v7920_v55 = vpack.c.bf16 %v3466_v4, %v3454_v48  ;;  %v7926_v48 = vpack.c.bf16 %v9963_v54, %v3484_v59  ;;  %v4607_v4 = vand.u32 4294901760, %v4602_v24  ;;  %v4616_v59 = vand.u32 4294901760, %v4605_v36 }
  0xab   :  { %7945 = vmatprep.subr.bf16.mxu1 %v7944_v12  ;;  %v4696_v62 = vsub.f32 %v9478_v25, %v4695_v14 }
  0xac   :  { %3558 = vmatmul.mubr.f32.vlgmr.msra.gmra.mrb[6].mxu0 %v8916_v21  ;;  %v9476_v28 = vsub.f32 %v4602_v24, %v4607_v4  ;;  %v9494_v42 = vsub.f32 %v4605_v36, %v4616_v59  ;;  %v9522_v19 = vpack.c.bf16 %v4616_v59, %v4613_v37 }
  0xad   :  { %3989 = vmatmul.mubr.f32.vlgmr.msra.gmra.mrb[8].mxu1 %v9077_v1  ;;  %7907 = vmatpush1.bf16.msra.mxu0 %v7906_v15  ;;  %v4697_v35 = vand.u32 4294901760, %v4696_v62  ;;  %v8229_v62 = vld [vmem:[%s9946_s4 + $0x60] sm:$0xff]  }
  0xae   :  { %7947 = vmatpush1.bf16.msra.mxu1 %v7946_v7  ;;  %7909 = vmatprep.subr.bf16.mxu0 %v7908_v45  ;;  %v4688_v53 = vand.u32 4294901760, %v9476_v28  ;;  %v4709_v41 = vand.u32 4294901760, %v9494_v42  ;;  %v7997_v15 = vpack.c.bf16 %v9478_v25, %v9476_v28  ;;  %v4600_v45 = vld [vmem:[%s9945_s5 + $0x10] sm:$0xff] }
  0xaf   :  { %7949 = vmatprep.subr.bf16.mxu1 %v7948_v5  ;;  %3644 = vmatprep.mubr.f32.mxu0 %v8283_v3  ;;  %v7958_v5 = vpack.c.bf16 %v9352_v16, %v9349_v27  ;;  %v8284_v27 = vmov 0.0|0.0  }
  0xb0   :  { %4099 = vmatprep.mubr.f32.mxu1 %v8283_v3  ;;  %v4689_v16 = vsub.f32 %v9476_v28, %v4688_v53  ;;  %v4710_v12 = vsub.f32 %v9494_v42, %v4709_v41 }
  0xb1   :  { %7911 = vmatpush1.bf16.msra.mxu0 %v7910_v23 }
  0xb2   :  { %7951 = vmatpush1.bf16.msra.mxu1 %v7950_v47  ;;  %7913 = vmatprep.subr.bf16.mxu0 %v9232_v9  ;;  %v4690_v32 = vand.u32 4294901760, %v4689_v16  ;;  %v5098_v47 = vand.u32 4294901760, %v4600_v45  ;;  %v8228_v16 = vld [vmem:[%s9946_s4 + $0x88] sm:$0xff]  }
  0xb3   :  { %7953 = vmatprep.subr.bf16.mxu1 %v7952_v61 }
  0xb4   :  { %3647 = vmatmul.mubr.f32.vlgmr.msra.gmra.mrb[6].mxu0 %v8959_v60  ;;  %v7991_v7 = vpack.c.bf16 %v4697_v35, %v4690_v32  ;;  %v8236_v32 = vld [vmem:[%s9946_s4 + $0x98] sm:$0xff]   ;;  %v8237_v35 = vld [vmem:[%s9946_s4 + $0x70] sm:$0xff]  }
  0xb5   :  { %4101 = vmatmul.mubr.f32.vlgmr.msra.gmra.mrb[8].mxu1 %v8916_v21  ;;  %7915 = vmatpush1.bf16.msra.mxu0 %v9234_v52 }
  0xb6   :  { %7955 = vmatpush1.bf16.msra.mxu1 %v7954_v18  ;;  %7917 = vmatprep.subr.bf16.mxu0 %v9276_v13 }
  0xb7   :  { %7957 = vmatprep.subr.bf16.mxu1 %v7956_v22  ;;  %3725 = vmatprep.mubr.f32.mxu0 %v8283_v3 }
  0xb8   :  { %4187 = vmatprep.mubr.f32.mxu1 %v8283_v3 }
  0xb9   :  { %7919 = vmatpush1.bf16.msra.mxu0 %v9278_v33 }
  0xba   :  { %7959 = vmatpush1.bf16.msra.mxu1 %v7958_v5  ;;  %7921 = vmatprep.subr.bf16.mxu0 %v7920_v55  ;;  %v8009_v5 = vpack.c.bf16 %v4695_v14, %v4688_v53  ;;  %v9566_v55 = vsub.f32 %v4600_v45, %v5098_v47  ;;  %v8223_v53 = vld [vmem:[%s9946_s4 + $0x10] sm:$0xff]   ;;  %v8225_v14 = vld [vmem:[%s9946_s4 + $0x58] sm:$0xff]  }
  0xbb   :  { %7961 = vmatprep.subr.bf16.mxu1 %v9336_v6  ;;  %v8241_v45 = vld [vmem:[%s9946_s4 + $0x78] sm:$0xff]  }
  0xbc   :  { %3729 = vmatmul.mubr.f32.vlgmr.msra.gmra.mrb[6].mxu0 %v9013_v49  ;;  %v5187_v54 = vand.u32 4294901760, %v9566_v55 }
  0xbd   :  { %4190 = vmatmul.mubr.f32.vlgmr.msra.gmra.mrb[8].mxu1 %v8959_v60  ;;  %7923 = vmatpush1.bf16.msra.mxu0 %v7922_v56 }
  0xbe   :  { %7963 = vmatpush1.bf16.msra.mxu1 %v9367_v20  ;;  %7925 = vmatprep.subr.bf16.mxu0 %v7924_v50 }
  0xbf   :  { %7965 = vmatprep.subr.bf16.mxu1 %v9370_v39  ;;  %3823 = vmatprep.mubr.f32.mxu0 %v8283_v3 }
  0xc0   :  { %4268 = vmatprep.mubr.f32.mxu1 %v8283_v3 }
  0xc1   :  { %7927 = vmatpush1.bf16.msra.mxu0 %v7926_v48 }
  0xc2   :  { %7967 = vmatpush1.bf16.msra.mxu1 %v9390_v0  ;;  %7929 = vmatprep.subr.bf16.mxu0 %v9232_v9  ;;  %v9487_v9 = vsub.f32 %v4604_v29, %v4613_v37  ;;  %v5188_v29 = vsub.f32 %v9566_v55, %v5187_v54 }
  0xc3   :  { %7969 = vmatprep.subr.bf16.mxu1 %v7968_v11 }
  0xc4   :  { %3825 = vmatmul.mubr.f32.vlgmr.msra.gmra.mrb[6].mxu0 %v8916_v21  ;;  %v8000_v23 = vpack.c.bf16 %v9494_v42, %v9487_v9  ;;  %v5189_v36 = vand.u32 4294901760, %v5188_v29  ;;  %v8222_v42 = vld [vmem:[%s9946_s4 + $0xc0] sm:$0xff]  }
  0xc5   :  { %4272 = vmatmul.mubr.f32.vlgmr.msra.gmra.mrb[8].mxu1 %v9013_v49  ;;  %7931 = vmatpush1.bf16.msra.mxu0 %v9234_v52  ;;  %v9501_v52 = vpack.c.bf16 %v4610_v2, %v4607_v4  ;;  %v8250_v29 = vld [vmem:[%s9946_s4 + $0x100] sm:$0xff]  }
  0xc6   :  { %7971 = vmatpush1.bf16.msra.mxu1 %v7970_v31  ;;  %7933 = vmatprep.subr.bf16.mxu0 %v9276_v13  ;;  %v4702_v13 = vand.u32 4294901760, %v9487_v9 }
  0xc7   :  { %7973 = vmatprep.subr.bf16.mxu1 %v7972_v10  ;;  %3903 = vmatprep.mubr.f32.mxu0 %v8283_v3 }
  0xc8   :  { %4366 = vmatprep.mubr.f32.mxu1 %v8283_v3  ;;  %v8012_v30 = vpack.c.bf16 %v4709_v41, %v4702_v13  ;;  %v8231_v41 = vld [vmem:[%s9946_s4 + $0x20] sm:$0xff]  }
  0xc9   :  { %7935 = vmatpush1.bf16.msra.mxu0 %v9278_v33  ;;  %v9512_v33 = vld [vmem:[%s9945_s5] sm:$0xff] }
  0xca   :  { %7975 = vmatpush1.bf16.msra.mxu1 %v7974_v63  ;;  %7984 = vmatprep.subr.bf16.mxu0 %v8284_v27  ;;  %v5092_v58 = vand.u32 4294901760, %v9512_v33  ;;  %v8221_v63 = vld [vmem:[%s9946_s4 + $0x50] sm:$0xff]  }
  0xcb   :  { %7977 = vmatprep.subr.bf16.mxu1 %v9336_v6  ;;  %v4703_v6 = vsub.f32 %v9487_v9, %v4702_v13  ;;  %v8219_v9 = vld [vmem:[%s9946_s4 + $0x48] sm:$0xff]   ;;  %v8227_v13 = vld [vmem:[%s9946_s4 + $0x18] sm:$0xff]  }
  0xcc   :  { %3905 = vmatmul.mubr.f32.vlgmr.msra.gmra.mrb[6].mxu0 %v8916_v21  ;;  %v9546_v40 = vsub.f32 %v9512_v33, %v5092_v58  ;;  %v8021_v2 = vpack.c.bf16 %v5095_v38, %v5092_v58  ;;  %v8232_v33 = vld [vmem:[%s9946_s4 + $0x90] sm:$0xff]   ;;  %v8238_v58 = vld [vmem:[%s9946_s4 + $0xe0] sm:$0xff]  }
  0xcd   :  { %4368 = vmatmul.mubr.f32.vlgmr.msra.gmra.mrb[8].mxu1 %v8916_v21  ;;  %7986 = vmatpush3.bf16.msra.mxu0 %v9501_v52 }
  0xce   :  { %7979 = vmatpush1.bf16.msra.mxu1 %v9367_v20  ;;  %4446 = vmatprep.mubr.f32.mxu1 %v8283_v3  ;;  %v4704_v20 = vand.u32 4294901760, %v4703_v6  ;;  %v5173_v22 = vand.u32 4294901760, %v9546_v40  ;;  %v8235_v6 = vld [vmem:[%s9946_s4 + $0x28] sm:$0xff]  }
  0xcf   :  { %7981 = vmatprep.subr.bf16.mxu1 %v9370_v39  ;;  %7987 = vmatprep.subr.bf16.mxu0 %v8284_v27  ;;  %v4711_v39 = vand.u32 4294901760, %v4710_v12 }
  0xd0   :  { %7368 = vmatprep.mubr.msk.f32.mxu0 %vm8285_vm1, %v8283_v3  ;;  %v5174_v50 = vsub.f32 %v9546_v40, %v5173_v22 }
  0xd1   :  { %7989 = vmatpush3.bf16.msra.mxu0 %v9522_v19  ;;  %v7994_v61 = vpack.c.bf16 %v4711_v39, %v4704_v20  ;;  %v8240_v39 = vld [vmem:[%s9946_s4 + $0xa0] sm:$0xff]  }
  0xd2   :  { %7983 = vmatpush1.bf16.msra.mxu1 %v9390_v0  ;;  %7996 = vmatprep.subr.bf16.mxu0 %v8284_v27  ;;  %v4601_v0 = vld [vmem:[%s9945_s5 + $0x18] sm:$0xff]  ;;  %v5175_v4 = vand.u32 4294901760, %v5174_v50 }
  0xd3   :  { %7990 = vmatprep.subr.bf16.mxu1 %v8284_v27  ;;  %v5101_v18 = vand.u32 4294901760, %v4601_v0 }
  0xd4   :  { %7369 = vmatmul.mubr.f32.vlgmr.msra.gmra.mrb[8].mxu0 %v9077_v1  ;;  %v5180_v1 = vand.u32 4294901760, %v9549_v26 }
  0xd5   :  { %4448 = vmatmul.mubr.f32.vlgmr.msra.gmra.mrb[8].mxu1 %v8916_v21  ;;  %7998 = vmatpush3.bf16.msra.mxu0 %v7997_v15  ;;  %v5193_v56 = vsub.f32 %v4601_v0, %v5101_v18  ;;  %v8024_v11 = vpack.c.bf16 %v5101_v18, %v5098_v47  ;;  %v8244_v0 = vld [vmem:[%s9946_s4 + $0xa8] sm:$0xff]   ;;  %v8245_v47 = vld [vmem:[%s9946_s4 + $0xf0] sm:$0xff]  }
  0xd6   :  { %7992 = vmatpush3.bf16.msra.mxu1 %v7991_v7  ;;  %7379 = vmatprep.mubr.msk.f32.mxu1 %vm8285_vm1, %v8283_v3  ;;  %v5181_v24 = vsub.f32 %v9549_v26, %v5180_v1  ;;  %v8045_v10 = vpack.c.bf16 %v5180_v1, %v5173_v22  ;;  %v8239_v7 = vld [vmem:[%s9946_s4 + $0x30] sm:$0xff]   ;;  %v8247_v1 = vld [vmem:[%s9946_s4 + $0xf8] sm:$0xff]  }
  0xd7   :  { %7993 = vmatprep.subr.bf16.mxu1 %v8284_v27  ;;  %7999 = vmatprep.subr.bf16.mxu0 %v8284_v27  ;;  %v5194_v48 = vand.u32 4294901760, %v5193_v56  ;;  %v8036_v25 = vpack.c.bf16 %v5193_v56, %v9566_v55  ;;  %v8246_v22 = vld [vmem:[%s9946_s4 + $0xb0] sm:$0xff]   ;;  %v8254_v55 = vld [vmem:[%s9946_s4 + $0x1c0] sm:$0xff]  }
  0xd8   :  { %7390 = vmatprep.mubr.msk.f32.mxu0 %vm8285_vm1, %v8283_v3 }
  0xd9   :  { %8001 = vmatpush3.bf16.msra.mxu0 %v8000_v23  ;;  %v5195_v44 = vsub.f32 %v5193_v56, %v5194_v48  ;;  %v8249_v23 = vld [vmem:[%s9946_s4 + $0x140] sm:$0xff]  }
  0xda   :  { %7995 = vmatpush3.bf16.msra.mxu1 %v7994_v61  ;;  %8008 = vmatprep.subr.bf16.mxu0 %v8284_v27 }
  0xdb   :  { %8002 = vmatprep.subr.bf16.mxu1 %v8284_v27  ;;  %v5196_v31 = vand.u32 4294901760, %v5195_v44 }
  0xdc   :  { %7391 = vmatmul.mubr.f32.vlgmr.msra.gmra.mrb[10].mxu0 %v8959_v60  ;;  %v5182_v60 = vand.u32 4294901760, %v5181_v24 }
  0xdd   :  { %7380 = vmatmul.mubr.f32.vlgmr.msra.gmra.mrb[10].mxu1 %v8916_v21  ;;  %8010 = vmatpush3.bf16.msra.mxu0 %v8009_v5  ;;  %v8030_v59 = vpack.c.bf16 %v5196_v31, %v5189_v36  ;;  %v8248_v5 = vld [vmem:[%s9946_s4 + $0xb8] sm:$0xff]  }
  0xde   :  { %8004 = vmatpush3.bf16.msra.mxu1 %v9501_v52  ;;  %7401 = vmatprep.mubr.msk.f32.mxu1 %vm8285_vm1, %v8283_v3  ;;  %v8027_v28 = vpack.c.bf16 %v5182_v60, %v5175_v4 }
  0xdf   :  { %8005 = vmatprep.subr.bf16.mxu1 %v8284_v27  ;;  %8011 = vmatprep.subr.bf16.mxu0 %v8284_v27 }
  0xe0   :  { %7412 = vmatprep.mubr.msk.f32.mxu0 %vm8285_vm1, %v8283_v3 }
  0xe1   :  { %8013 = vmatpush3.bf16.msra.mxu0 %v8012_v30 }
  0xe2   :  { %8007 = vmatpush3.bf16.msra.mxu1 %v9522_v19  ;;  %8020 = vmatprep.subr.bf16.mxu0 %v8284_v27 }
  0xe3   :  { %8014 = vmatprep.subr.bf16.mxu1 %v8284_v27 }
  0xe4   :  { %7413 = vmatmul.mubr.f32.vlgmr.msra.gmra.mrb[12].mxu0 %v8916_v21 }
  0xe5   :  { %v9589_v17 = vpop.f32.mrb[0].mxu1  ;;  %7402 = vmatmul.mubr.f32.vlgmr.msra.gmra.mrb[12].mxu1 %v9013_v49  ;;  %8022 = vmatpush3.bf16.msra.mxu0 %v8021_v2  ;;  %v8033_v49 = vpack.c.bf16 %v9549_v26, %v9546_v40  ;;  %v8242_v40 = vld [vmem:[%s9946_s4 + $0xe8] sm:$0xff]   ;;  %v8243_v26 = vld [vmem:[%s9946_s4 + $0x38] sm:$0xff]  }
  0xe6   :  { %v9592_v37 = vpop.f32.mrb[1].mxu1  ;;  %8016 = vmatpush3.bf16.msra.mxu1 %v9501_v52  ;;  %7423 = vmatprep.mubr.msk.f32.mxu1 %vm8285_vm1, %v8283_v3  ;;  %v8226_v52 = vld [vmem:[%s9946_s4 + $0xc8] sm:$0xff]  }
  0xe7   :  { %8017 = vmatprep.subr.bf16.mxu1 %v8284_v27  ;;  %8023 = vmatprep.subr.bf16.mxu0 %v8284_v27 }
  0xe8   :  { %7434 = vmatprep.mubr.msk.f32.mxu0 %vm8285_vm1, %v8283_v3 }
  0xe9   :  { %8025 = vmatpush3.bf16.msra.mxu0 %v8024_v11 }
  0xea   :  { %8019 = vmatpush3.bf16.msra.mxu1 %v9522_v19  ;;  %8032 = vmatprep.subr.bf16.mxu0 %v8284_v27  ;;  %v8234_v19 = vld [vmem:[%s9946_s4 + $0xd8] sm:$0xff]  }
  0xeb   :  { %8026 = vmatprep.subr.bf16.mxu1 %v8284_v27 }
  0xec   :  { %7435 = vmatmul.mubr.f32.vlgmr.msra.gmra.mrb[14].mxu0 %v8467_v8  ;;  %v8048_v8 = vpack.c.bf16 %v5194_v48, %v5187_v54 }
  0xed   :  { %7424 = vmatmul.mubr.f32.vlgmr.msra.gmra.mrb[14].mxu1 %v8916_v21  ;;  %8034 = vmatpush3.bf16.msra.mxu0 %v8033_v49  ;;  %v8217_v21 = vld [vmem:[%s9946_s4 + $0x40] sm:$0xff]  }
  0xee   :  { %8028 = vmatpush3.bf16.msra.mxu1 %v8027_v28  ;;  %7445 = vmatprep.mubr.msk.f32.mxu1 %vm8285_vm1, %v8283_v3 }
  0xef   :  { %8029 = vmatprep.subr.bf16.mxu1 %v8284_v27  ;;  %8035 = vmatprep.subr.bf16.mxu0 %v8284_v27 }
  0xf0   :  { %7456 = vmatprep.mubr.msk.f32.mxu0 %vm8285_vm1, %v8283_v3 }
  0xf1   :  { %8037 = vmatpush3.bf16.msra.mxu0 %v8036_v25  ;;  %v8255_v25 = vld [vmem:[%s9946_s4 + $0x110] sm:$0xff]  }
  0xf2   :  { %8031 = vmatpush3.bf16.msra.mxu1 %v8030_v59  ;;  %8044 = vmatprep.subr.bf16.mxu0 %v8284_v27 }
  0xf3   :  { %8038 = vmatprep.subr.bf16.mxu1 %v8284_v27 }
  0xf4   :  { %7457 = vmatmul.mubr.f32.vlgmr.msra.gmra.mrb[16].mxu0 %v8419_v43  ;;  %v8218_v43 = vld [vmem:[%s9946_s4] sm:$0xff]  }
  0xf5   :  { %7446 = vmatmul.mubr.f32.vlgmr.msra.gmra.mrb[16].mxu1 %v8407_v34  ;;  %8046 = vmatpush3.bf16.msra.mxu0 %v8045_v10  ;;  %v8256_v10 = vld [vmem:[%s9946_s4 + $0x180] sm:$0xff]  }
  0xf6   :  { %8040 = vmatpush3.bf16.msra.mxu1 %v8021_v2  ;;  %7467 = vmatprep.mubr.msk.f32.mxu1 %vm8285_vm1, %v8283_v3 }
  0xf7   :  { %8041 = vmatprep.subr.bf16.mxu1 %v8284_v27  ;;  %8047 = vmatprep.subr.bf16.mxu0 %v8284_v27 }
  0xf8   :  { %7478 = vmatprep.mubr.msk.f32.mxu0 %vm8285_vm1, %v8283_v3 }
  0xf9   :  { %8049 = vmatpush3.bf16.msra.mxu0 %v8048_v8  ;;  %v8257_v8 = vld [vmem:[%s9946_s4 + $0x158] sm:$0xff]  }
  0xfa   :  { %8043 = vmatpush3.bf16.msra.mxu1 %v8024_v11  ;;  %7224 = vmatprep.subr.bf16.mxu0 %v8217_v21 }
  0xfb   :  { %8050 = vmatprep.subr.bf16.mxu1 %v8284_v27 }
  0xfc   :  { %7479 = vmatmul.mubr.f32.vlgmr.msra.gmra.mrb[18].mxu0 %v8407_v34 }
  0xfd   :  { %7468 = vmatmul.mubr.f32.vlgmr.msra.gmra.mrb[18].mxu1 %v8439_v51  ;;  %7225 = vmatpush3.bf16.msra.mxu0 %v8218_v43  ;;  %v8224_v51 = vld [vmem:[%s9946_s4 + $0x80] sm:$0xff]   ;;  %v8258_v43 = vld [vmem:[%s9946_s4 + $0x1c8] sm:$0xff]  }
  0xfe   :  { %8052 = vmatpush3.bf16.msra.mxu1 %v8021_v2  ;;  %7489 = vmatprep.mubr.msk.f32.mxu1 %vm8285_vm1, %v8283_v3 }
  0xff   :  { %8053 = vmatprep.subr.bf16.mxu1 %v8284_v27  ;;  %7226 = vmatprep.subr.bf16.mxu0 %v8219_v9  ;;  %v8259_v9 = vld [vmem:[%s9946_s4 + $0x118] sm:$0xff]  }
 0x101   :  { %7227 = vmatpush3.bf16.msra.mxu0 %v8220_v57  ;;  %v8260_v57 = vld [vmem:[%s9946_s4 + $0x188] sm:$0xff]  }
 0x102   :  { %8055 = vmatpush3.bf16.msra.mxu1 %v8024_v11  ;;  %7228 = vmatprep.subr.bf16.mxu0 %v8221_v63  ;;  %v8252_v11 = vld [vmem:[%s9946_s4 + $0x108] sm:$0xff]   ;;  %v8261_v63 = vld [vmem:[%s9946_s4 + $0x160] sm:$0xff]  }
 0x103   :  { %7246 = vmatprep.subr.bf16.mxu1 %v8222_v42  ;;  %v8262_v42 = vld [vmem:[%s9946_s4 + $0x1d0] sm:$0xff]  }
 0x105   :  { %7490 = vmatmul.mubr.f32.vlgmr.msra.gmra.mrb[20].mxu1 %v8407_v34  ;;  %7229 = vmatpush3.bf16.msra.mxu0 %v8223_v53  ;;  %v8230_v34 = vld [vmem:[%s9946_s4 + $0xd0] sm:$0xff]   ;;  %v8263_v53 = vld [vmem:[%s9946_s4 + $0x120] sm:$0xff]  }
 0x106   :  { %7247 = vmatpush3.bf16.msra.mxu1 %v8224_v51  ;;  %7230 = vmatprep.subr.bf16.mxu0 %v8225_v14  ;;  %v8264_v51 = vld [vmem:[%s9946_s4 + $0x190] sm:$0xff]   ;;  %v8265_v14 = vld [vmem:[%s9946_s4 + $0x168] sm:$0xff]  }
 0x107   :  { %7248 = vmatprep.subr.bf16.mxu1 %v8226_v52  ;;  %v8266_v52 = vld [vmem:[%s9946_s4 + $0x1d8] sm:$0xff]  }
 0x109   :  { %7231 = vmatpush3.bf16.msra.mxu0 %v8227_v13  ;;  %v8267_v13 = vld [vmem:[%s9946_s4 + $0x128] sm:$0xff]  }
 0x10a   :  { %7249 = vmatpush3.bf16.msra.mxu1 %v8228_v16  ;;  %7232 = vmatprep.subr.bf16.mxu0 %v8229_v62  ;;  %v8268_v16 = vld [vmem:[%s9946_s4 + $0x198] sm:$0xff]   ;;  %v8269_v62 = vld [vmem:[%s9946_s4 + $0x170] sm:$0xff]  }
 0x10b   :  { %7250 = vmatprep.subr.bf16.mxu1 %v8230_v34  ;;  %v8270_v34 = vld [vmem:[%s9946_s4 + $0x1e0] sm:$0xff]  }
 0x10d   :  { %7233 = vmatpush3.bf16.msra.mxu0 %v8231_v41  ;;  %v8271_v41 = vld [vmem:[%s9946_s4 + $0x130] sm:$0xff]  }
 0x10e   :  { %7251 = vmatpush3.bf16.msra.mxu1 %v8232_v33  ;;  %7234 = vmatprep.subr.bf16.mxu0 %v8233_v46  ;;  %v8272_v33 = vld [vmem:[%s9946_s4 + $0x1a0] sm:$0xff]   ;;  %v8273_v46 = vld [vmem:[%s9946_s4 + $0x178] sm:$0xff]  }
 0x10f   :  { %v613_v12 = vpop.f32.mrb[0].mxu0  ;;  %7252 = vmatprep.subr.bf16.mxu1 %v8234_v19  ;;  %v8274_v19 = vld [vmem:[%s9946_s4 + $0x1e8] sm:$0xff]  }
 0x110   :  { %v8110_v38 = vadd.f32 %v613_v12, %v9589_v17  ;;  %v615_v20 = vpop.f32.mrb[1].mxu0  ;;  %v8251_v17 = vld [vmem:[%s9946_s4 + $0x148] sm:$0xff]   ;;  %v8278_v12 = vld [vmem:[%s9946_s4 + $0x1b0] sm:$0xff]  }
 0x111   :  { %v8111_v15 = vadd.f32 %v615_v20, %v9592_v37  ;;  %7235 = vmatpush3.bf16.msra.mxu0 %v8235_v6  ;;  %v8253_v37 = vld [vmem:[%s9946_s4 + $0x150] sm:$0xff]   ;;  %v8275_v6 = vld [vmem:[%s9946_s4 + $0x138] sm:$0xff]  }
 0x112   :  { %7253 = vmatpush3.bf16.msra.mxu1 %v8236_v32  ;;  %7236 = vmatprep.subr.bf16.mxu0 %v8237_v35  ;;  %v8276_v32 = vld [vmem:[%s9946_s4 + $0x1a8] sm:$0xff]   ;;  %v8277_v35 = vld [vmem:[%s9946_s4 + $0x1f0] sm:$0xff]  }
 0x113   :  { %7254 = vmatprep.subr.bf16.mxu1 %v8238_v58  ;;  %v8279_v58 = vld [vmem:[%s9946_s4 + $0x1f8] sm:$0xff]  }
 0x115   :  { %7237 = vmatpush3.bf16.msra.mxu0 %v8239_v7 }
 0x116   :  { %7255 = vmatpush3.bf16.msra.mxu1 %v8240_v39  ;;  %7238 = vmatprep.subr.bf16.mxu0 %v8241_v45 }
 0x117   :  { %7256 = vmatprep.subr.bf16.mxu1 %v8242_v40 }
 0x118   :  { %v1156_v61 = vpop.f32.mrb[2].mxu1 }
 0x119   :  { %v1158_v18 = vpop.f32.mrb[3].mxu1  ;;  %7239 = vmatpush3.bf16.msra.mxu0 %v8243_v26 }
 0x11a   :  { %7257 = vmatpush3.bf16.msra.mxu1 %v8244_v0  ;;  %7268 = vmatprep.subr.bf16.mxu0 %v8249_v23 }
 0x11b   :  { %7258 = vmatprep.subr.bf16.mxu1 %v8245_v47 }
 0x11e   :  { %7259 = vmatpush3.bf16.msra.mxu1 %v8246_v22 }
 0x11f   :  { %7260 = vmatprep.subr.bf16.mxu1 %v8247_v1 }
 0x122   :  { %7261 = vmatpush3.bf16.msra.mxu1 %v8248_v5 }
 0x123   :  { %7290 = vmatprep.subr.bf16.mxu1 %v8254_v55 }
 0x13f   :  { %v9736_v56 = vpop.f32.mrb[2].mxu0 }
 0x140   :  { %v9738_v50 = vpop.f32.mrb[3].mxu0 }
 0x148   :  { %v9740_v24 = vpop.f32.mrb[4].mxu1 }
 0x149   :  { %v9742_v30 = vpop.f32.mrb[5].mxu1 }
 0x16f   :  { %v2820_v54 = vpop.f32.mrb[4].mxu0 }
 0x170   :  { %v4454_v48 = vmul.f32 %v8110_v38, %v2820_v54  ;;  %v2822_v4 = vpop.f32.mrb[5].mxu0  ;;  %v8280_v38 = vld [vmem:[%s9946_s4 + $0x1b8] sm:$0xff]  }
 0x171   :  { %v4455_v60 = vmul.f32 %v8111_v15, %v2822_v4 }
 0x172   :  { %v4462_v44 = vpack.c.bf16 %v4454_v48, %v4454_v48 }
 0x173   :  { %v4463_v2 = vpack.c.bf16 %v4455_v60, %v4455_v60 }
 0x175   :  { %5992 = vmatprep.mubr.bf16.mxu0 %v4463_v2 }
 0x176   :  { %5993 = vmatmul.mubr.bf16.vlgmr.msra.gmra.mrb[20].mxu0 %v4462_v44 }
 0x177   :  { %7269 = vmatpush3.bf16.msra.mxu0 %v8250_v29 }
 0x178   :  { %v3363_v36 = vpop.f32.mrb[6].mxu1  ;;  %7270 = vmatprep.subr.bf16.mxu0 %v8251_v17 }
 0x179   :  { %v4456_v31 = vmul.f32 %v3363_v36, %v1156_v61  ;;  %v3365_v49 = vpop.f32.mrb[7].mxu1 }
 0x17a   :  { %v4457_v28 = vmul.f32 %v3365_v49, %v1158_v18 }
 0x17b   :  { %7271 = vmatpush3.bf16.msra.mxu0 %v8252_v11  ;;  %v4464_v21 = vpack.c.bf16 %v4456_v31, %v4456_v31 }
 0x17c   :  { %v4465_v59 = vpack.c.bf16 %v4457_v28, %v4457_v28  ;;  %7272 = vmatprep.subr.bf16.mxu0 %v8253_v37 }
 0x17e   :  { %6032 = vmatprep.mubr.bf16.mxu1 %v4465_v59 }
 0x17f   :  { %6033 = vmatmul.mubr.bf16.vlgmr.msra.gmra.mrb[24].mxu1 %v4464_v21  ;;  %7273 = vmatpush3.bf16.msra.mxu0 %v8255_v25 }
 0x180   :  { %7291 = vmatpush3.bf16.msra.mxu1 %v8256_v10  ;;  %7274 = vmatprep.subr.bf16.mxu0 %v8257_v8 }
 0x181   :  { %7292 = vmatprep.subr.bf16.mxu1 %v8258_v43 }
 0x183   :  { %7275 = vmatpush3.bf16.msra.mxu0 %v8259_v9 }
 0x184   :  { %7293 = vmatpush3.bf16.msra.mxu1 %v8260_v57  ;;  %7276 = vmatprep.subr.bf16.mxu0 %v8261_v63 }
 0x185   :  { %7294 = vmatprep.subr.bf16.mxu1 %v8262_v42 }
 0x187   :  { %7277 = vmatpush3.bf16.msra.mxu0 %v8263_v53 }
 0x188   :  { %7295 = vmatpush3.bf16.msra.mxu1 %v8264_v51  ;;  %7278 = vmatprep.subr.bf16.mxu0 %v8265_v14 }
 0x189   :  { %7296 = vmatprep.subr.bf16.mxu1 %v8266_v52  ;;  %v6128_v52 = vld [vmem:[%s9947_s8] sm:$0xff] }
 0x18b   :  { %7279 = vmatpush3.bf16.msra.mxu0 %v8267_v13  ;;  %v6129_v13 = vld [vmem:[%s9947_s8 + $0x8] sm:$0xff] }
 0x18c   :  { %7297 = vmatpush3.bf16.msra.mxu1 %v8268_v16  ;;  %7280 = vmatprep.subr.bf16.mxu0 %v8269_v62  ;;  %v6139_v16 = vand.u32 4294901760, %v6128_v52  ;;  %v6142_v62 = vand.u32 4294901760, %v6129_v13 }
 0x18d   :  { %7298 = vmatprep.subr.bf16.mxu1 %v8270_v34 }
 0x18e   :  { %v9850_v34 = vpack.c.bf16 %v6142_v62, %v6139_v16 }
 0x18f   :  { %7281 = vmatpush3.bf16.msra.mxu0 %v8271_v41  ;;  %v9852_v41 = vsub.f32 %v6128_v52, %v6139_v16 }
 0x190   :  { %7299 = vmatpush3.bf16.msra.mxu1 %v8272_v33  ;;  %7282 = vmatprep.subr.bf16.mxu0 %v8273_v46  ;;  %v9854_v33 = vsub.f32 %v6129_v13, %v6142_v62  ;;  %v6130_v46 = vld [vmem:[%s9947_s8 + $0x10] sm:$0xff]  ;;  %v6624_v62 = vld [vmem:[%s9949_s9] sm:$0xff] }
 0x191   :  { %7300 = vmatprep.subr.bf16.mxu1 %v8274_v19  ;;  %v6131_v19 = vld [vmem:[%s9947_s8 + $0x18] sm:$0xff] }
 0x193   :  { %7283 = vmatpush3.bf16.msra.mxu0 %v8275_v6  ;;  %v6145_v6 = vand.u32 4294901760, %v6130_v46 }
 0x194   :  { %7301 = vmatpush3.bf16.msra.mxu1 %v8276_v32  ;;  %8056 = vmatprep.subr.bf16.mxu0 %v8284_v27  ;;  %v6148_v32 = vand.u32 4294901760, %v6131_v19 }
 0x195   :  { %7302 = vmatprep.subr.bf16.mxu1 %v8277_v35  ;;  %v6220_v35 = vand.u32 4294901760, %v9852_v41 }
 0x198   :  { %7303 = vmatpush3.bf16.msra.mxu1 %v8278_v12  ;;  %v6227_v12 = vand.u32 4294901760, %v9854_v33 }
 0x199   :  { %7304 = vmatprep.subr.bf16.mxu1 %v8279_v58  ;;  %v9866_v58 = vpack.c.bf16 %v6148_v32, %v6145_v6 }
 0x19c   :  { %7305 = vmatpush3.bf16.msra.mxu1 %v8280_v38  ;;  %v9868_v38 = vsub.f32 %v6130_v46, %v6145_v6 }
 0x19d   :  { %8092 = vmatprep.subr.bf16.mxu1 %v8284_v27 }
 0x19f   :  { %v3906_v20 = vpop.f32.mrb[6].mxu0 }
 0x1a0   :  { %v4458_v15 = vmul.f32 %v3906_v20, %v9736_v56  ;;  %v3908_v7 = vpop.f32.mrb[7].mxu0  ;;  %v9870_v20 = vsub.f32 %v6131_v19, %v6148_v32 }
 0x1a1   :  { %v4459_v39 = vmul.f32 %v3908_v7, %v9738_v50  ;;  %v6228_v7 = vsub.f32 %v9854_v33, %v6227_v12 }
 0x1a2   :  { %v4466_v40 = vpack.c.bf16 %v4458_v15, %v4458_v15  ;;  %v6221_v15 = vsub.f32 %v9852_v41, %v6220_v35 }
 0x1a3   :  { %v4467_v45 = vpack.c.bf16 %v4459_v39, %v4459_v39 }
 0x1a4   :  { %v6222_v39 = vand.u32 4294901760, %v6221_v15 }
 0x1a5   :  { %6072 = vmatprep.mubr.bf16.mxu0 %v4467_v45  ;;  %v6234_v45 = vand.u32 4294901760, %v9868_v38 }
 0x1a6   :  { %6073 = vmatmul.mubr.bf16.vlgmr.msra.gmra.mrb[24].mxu0 %v4466_v40  ;;  %v6241_v40 = vand.u32 4294901760, %v9870_v20 }
 0x1a7   :  { %v4681_v26 = vpop.f32.mrb[8].mxu0  ;;  %7500 = vmatprep.mubr.msk.f32.mxu0 %vm8285_vm1, %v8283_v3  ;;  %8058 = vmatpush3.bf16.msra.mxu0 %v9850_v34 }
 0x1a8   :  { %v4449_v0 = vpop.f32.mrb[8].mxu1  ;;  %v7370_v23 = vpop.f32.mrb[9].mxu0  ;;  %8059 = vmatprep.subr.bf16.mxu0 %v8284_v27 }
 0x1a9   :  { %v4460_v47 = vmul.f32 %v4449_v0, %v9740_v24  ;;  %v4451_v61 = vpop.f32.mrb[9].mxu1  ;;  %v6235_v0 = vsub.f32 %v9868_v38, %v6234_v45  ;;  %v6242_v23 = vsub.f32 %v9870_v20, %v6241_v40 }
 0x1aa   :  { %v4461_v18 = vmul.f32 %v4451_v61, %v9742_v30 }
 0x1ab   :  { %v4468_v1 = vpack.c.bf16 %v4460_v47, %v4460_v47  ;;  %8061 = vmatpush3.bf16.msra.mxu0 %v9866_v58  ;;  %v6236_v61 = vand.u32 4294901760, %v6235_v0 }
 0x1ac   :  { %v4469_v22 = vpack.c.bf16 %v4461_v18, %v4461_v18  ;;  %8062 = vmatprep.subr.bf16.mxu0 %v8284_v27  ;;  %v6243_v18 = vand.u32 4294901760, %v6242_v23 }
 0x1ae   :  { %6112 = vmatprep.mubr.bf16.mxu1 %v4469_v22  ;;  %v8066_v22 = vpack.c.bf16 %v6243_v18, %v6236_v61 }
 0x1af   :  { %6113 = vmatmul.mubr.bf16.vlgmr.msra.gmra.mrb[28].mxu1 %v4468_v1  ;;  %v4852_v5 = vpop.f32.mrb[10].mxu0  ;;  %v8069_v1 = vpack.c.bf16 %v9854_v33, %v9852_v41  ;;  %v6625_v41 = vld [vmem:[%s9949_s9 + $0x8] sm:$0xff]  ;;  %v6634_v33 = vand.u32 4294901760, %v6624_v62 }
 0x1b0   :  { %v4772_v55 = vpop.f32.mrb[10].mxu1  ;;  %v7392_v56 = vpop.f32.mrb[11].mxu0  ;;  %7562 = vmatprep.mubr.msk.f32.mxu1 %vm8285_vm1, %v8283_v3  ;;  %v6637_v46 = vand.u32 4294901760, %v6625_v41 }
 0x1b1   :  { %v4773_v50 = vadd.f32 %v4772_v55, %v4681_v26  ;;  %v7381_v54 = vpop.f32.mrb[11].mxu1  ;;  %v6229_v26 = vand.u32 4294901760, %v6228_v7  ;;  %v8081_v55 = vpack.c.bf16 %v6227_v12, %v6220_v35  ;;  %v8084_v56 = vpack.c.bf16 %v6241_v40, %v6234_v45 }
 0x1b2   :  { %v8093_v19 = vpack.c.bf16 %v6637_v46, %v6634_v33  ;;  %v6719_v6 = vsub.f32 %v6625_v41, %v6637_v46 }
 0x1b3   :  { %v4853_v48 = vadd.f32 %v4852_v5, %v4773_v50  ;;  %v8063_v47 = vpack.c.bf16 %v6229_v26, %v6222_v39  ;;  %v8072_v5 = vpack.c.bf16 %v9870_v20, %v9868_v38  ;;  %v9887_v50 = vld [vmem:[%s9948_s7] ss:$0 sm:$0xff] }
 0x1b4   :  { %6132 = vrot.lane.b32.xlu0 %v9887_v50, %s8286_s11  ;;  %8094 = vmatpush3.bf16.msra.mxu1 %v8093_v19  ;;  %v6720_v35 = vand.u32 4294901760, %v6719_v6 }
 0x1b5   :  { %8095 = vmatprep.subr.bf16.mxu1 %v8284_v27 }
 0x1b7   :  { %v5012_v4 = vpop.f32.mrb[12].mxu0 }
 0x1b8   :  { %v4929_v60 = vpop.f32.mrb[12].mxu1  ;;  %v7414_v2 = vpop.f32.mrb[13].mxu0  ;;  %6626 = vrot.lane.b32.xlu0 %v9887_v50, %s8287_s3 }
 0x1b9   :  { %v4930_v24 = vadd.f32 %v4929_v60, %v4853_v48  ;;  %v7403_v29 = vpop.f32.mrb[13].mxu1 }
 0x1bb   :  { %v5013_v44 = vadd.f32 %v5012_v4, %v4930_v24 }
 0x1bf   :  { %v5166_v30 = vpop.f32.mrb[14].mxu0 }
 0x1c0   :  { %v5087_v17 = vpop.f32.mrb[14].mxu1  ;;  %v7436_v11 = vpop.f32.mrb[15].mxu0 }
 0x1c1   :  { %v5088_v36 = vadd.f32 %v5087_v17, %v5013_v44  ;;  %v7425_v37 = vpop.f32.mrb[15].mxu1 }
 0x1c3   :  { %v5167_v31 = vadd.f32 %v5166_v30, %v5088_v36 }
 0x1c7   :  { %v5337_v49 = vpop.f32.mrb[16].mxu0 }
 0x1c8   :  { %v5257_v28 = vpop.f32.mrb[16].mxu1  ;;  %v7458_v25 = vpop.f32.mrb[17].mxu0 }
 0x1c9   :  { %v5258_v59 = vadd.f32 %v5257_v28, %v5167_v31  ;;  %v7447_v10 = vpop.f32.mrb[17].mxu1 }
 0x1cb   :  { %v5338_v8 = vadd.f32 %v5337_v49, %v5258_v59 }
 0x1cf   :  { %v5497_v21 = vpop.f32.mrb[18].mxu0 }
 0x1d0   :  { %v5414_v43 = vpop.f32.mrb[18].mxu1  ;;  %v7480_v9 = vpop.f32.mrb[19].mxu0 }
 0x1d1   :  { %v5415_v57 = vadd.f32 %v5414_v43, %v5338_v8  ;;  %v7469_v63 = vpop.f32.mrb[19].mxu1 }
 0x1d3   :  { %v5498_v42 = vadd.f32 %v5497_v21, %v5415_v57 }
 0x1d8   :  { %v5572_v53 = vpop.f32.mrb[20].mxu1 }
 0x1d9   :  { %v5573_v51 = vadd.f32 %v5572_v53, %v5498_v42  ;;  %v7491_v14 = vpop.f32.mrb[21].mxu1 }
 0x226   :  { %v6133_v45 = vpop.permute.xlu0 %6132 }
 0x249   :  { %v7240_v54 = vpop.f32.mrb[20].mxu0 }
 0x24a   :  { %v7241_v48 = vpop.f32.mrb[21].mxu0 }
 0x24b   :  { %v7242_v4 = vadd.f32 %v7241_v48, %v7240_v54  ;;  %v7243_v60 = vpop.f32.mrb[22].mxu0 }
 0x24c   :  { %v7244_v2 = vpop.f32.mrb[23].mxu0 }
 0x24d   :  { %v5995_v24 = vadd.f32 %v7242_v4, %v5573_v51 }
 0x252   :  { %v7262_v29 = vpop.f32.mrb[24].mxu1 }
 0x253   :  { %v7263_v44 = vpop.f32.mrb[25].mxu1 }
 0x254   :  { %v7264_v30 = vadd.f32 %v7263_v44, %v7262_v29  ;;  %v7265_v17 = vpop.f32.mrb[26].mxu1 }
 0x255   :  { %v7266_v11 = vpop.f32.mrb[27].mxu1 }
 0x256   :  { %v6035_v36 = vadd.f32 %v7264_v30, %v5995_v24 }
 0x279   :  { %v7284_v37 = vpop.f32.mrb[24].mxu0 }
 0x27a   :  { %v7285_v31 = vpop.f32.mrb[25].mxu0 }
 0x27b   :  { %v7286_v49 = vadd.f32 %v7285_v31, %v7284_v37  ;;  %v7287_v28 = vpop.f32.mrb[26].mxu0 }
 0x27c   :  { %v7288_v25 = vpop.f32.mrb[27].mxu0 }
 0x27d   :  { %v6075_v59 = vadd.f32 %v7286_v49, %v6035_v36 }
 0x282   :  { %v7306_v10 = vpop.f32.mrb[28].mxu1 }
 0x283   :  { %v7307_v8 = vpop.f32.mrb[29].mxu1 }
 0x284   :  { %v7308_v21 = vadd.f32 %v7307_v8, %v7306_v10  ;;  %v7309_v43 = vpop.f32.mrb[30].mxu1 }
 0x285   :  { %v7310_v9 = vpop.f32.mrb[31].mxu1 }
 0x286   :  { %v6115_v57 = vadd.f32 %v7308_v21, %v6075_v59 }
 0x288   :  { %v6126_v63 = vadd.f32 %v9887_v50, %v6115_v57 }
 0x28a   :  { %v6127_v42 = vmax.f32 %v6126_v63, 0.0 }
 0x28c   :  { %v6136_v53 = vsel %vm71_vm0, %v6127_v42, 0 }
 0x28d   :  { %v6207_v51 = vand.u32 4294901760, %v6136_v53 }
 0x28f   :  { %v6208_v14 = vsub.f32 %v6136_v53, %v6207_v51 }
 0x291   :  { %v6209_v52 = vand.u32 4294901760, %v6208_v14 }
 0x293   :  { %v6210_v13 = vsub.f32 %v6208_v14, %v6209_v52 }
 0x295   :  { %v6211_v16 = vand.u32 4294901760, %v6210_v13 }
 0x297   :  { %7501 = vmatmul.mubr.f32.vlgmr.msra.gmra.mrb[28].mxu0 %v6211_v16 }
 0x298   :  { %8064 = vmatpush3.bf16.msra.mxu0 %v8063_v47  ;;  %7511 = vmatprep.mubr.msk.f32.mxu0 %vm8285_vm1, %v8283_v3 }
 0x299   :  { %8065 = vmatprep.subr.bf16.mxu0 %v8284_v27 }
 0x29c   :  { %8067 = vmatpush3.bf16.msra.mxu0 %v8066_v22 }
 0x29d   :  { %8068 = vmatprep.subr.bf16.mxu0 %v8284_v27 }
 0x29f   :  { %7512 = vmatmul.mubr.f32.vlgmr.msra.gmra.mrb[28].mxu0 %v6207_v51 }
 0x2a0   :  { %8070 = vmatpush3.bf16.msra.mxu0 %v8069_v1  ;;  %7522 = vmatprep.mubr.msk.f32.mxu0 %vm8285_vm1, %v8283_v3 }
 0x2a1   :  { %8071 = vmatprep.subr.bf16.mxu0 %v8284_v27 }
 0x2a4   :  { %8073 = vmatpush3.bf16.msra.mxu0 %v8072_v5 }
 0x2a5   :  { %8074 = vmatprep.subr.bf16.mxu0 %v8284_v27 }
 0x2a7   :  { %7523 = vmatmul.mubr.f32.vlgmr.msra.gmra.mrb[28].mxu0 %v6208_v14 }
 0x2a8   :  { %8076 = vmatpush3.bf16.msra.mxu0 %v9850_v34  ;;  %7533 = vmatprep.mubr.msk.f32.mxu0 %vm8285_vm1, %v8283_v3 }
 0x2a9   :  { %8077 = vmatprep.subr.bf16.mxu0 %v8284_v27 }
 0x2ac   :  { %8079 = vmatpush3.bf16.msra.mxu0 %v9866_v58 }
 0x2ad   :  { %8080 = vmatprep.subr.bf16.mxu0 %v8284_v27 }
 0x2af   :  { %7534 = vmatmul.mubr.f32.vlgmr.msra.gmra.mrb[28].mxu0 %v6209_v52 }
 0x2b0   :  { %8082 = vmatpush3.bf16.msra.mxu0 %v8081_v55  ;;  %7544 = vmatprep.mubr.msk.f32.mxu0 %vm8285_vm1, %v8283_v3  ;;  %v6627_v55 = vpop.permute.xlu0 %6626 }
 0x2b1   :  { %8083 = vmatprep.subr.bf16.mxu0 %v8284_v27 }
 0x2b4   :  { %8085 = vmatpush3.bf16.msra.mxu0 %v8084_v56 }
 0x2b5   :  { %8086 = vmatprep.subr.bf16.mxu0 %v8284_v27 }
 0x2b7   :  { %7545 = vmatmul.mubr.f32.vlgmr.msra.gmra.mrb[28].mxu0 %v6207_v51 }
 0x2b8   :  { %8088 = vmatpush3.bf16.msra.mxu0 %v9850_v34  ;;  %7555 = vmatprep.mubr.msk.f32.mxu0 %vm8285_vm1, %v8283_v3  ;;  %v6712_v34 = vsub.f32 %v6624_v62, %v6634_v33 }
 0x2b9   :  { %8089 = vmatprep.subr.bf16.mxu0 %v8284_v27 }
 0x2ba   :  { %v6713_v32 = vand.u32 4294901760, %v6712_v34  ;;  %v8099_v7 = vpack.c.bf16 %v6719_v6, %v6712_v34 }
 0x2bc   :  { %8091 = vmatpush3.bf16.msra.mxu0 %v9866_v58  ;;  %v6714_v12 = vsub.f32 %v6712_v34, %v6713_v32  ;;  %v6721_v58 = vsub.f32 %v6719_v6, %v6720_v35  ;;  %v8105_v39 = vpack.c.bf16 %v6720_v35, %v6713_v32 }
 0x2be   :  { %v6715_v38 = vand.u32 4294901760, %v6714_v12  ;;  %v6722_v20 = vand.u32 4294901760, %v6721_v58 }
 0x2bf   :  { %7556 = vmatmul.mubr.f32.vlgmr.msra.gmra.mrb[28].mxu0 %v6207_v51 }
 0x2c0   :  { %v8096_v15 = vpack.c.bf16 %v6722_v20, %v6715_v38 }
 0x392   :  { %v6619_v40 = vpop.f32.mrb[28].mxu0 }
 0x393   :  { %v8112_v26 = vadd.f32 %v6619_v40, %v6133_v45  ;;  %v7557_v0 = vpop.f32.mrb[29].mxu0 }
 0x395   :  { %v6623_v23 = vmax.f32 %v8112_v26, 0.0 }
 0x397   :  { %v6631_v47 = vsel %vm6629_vm2, %v6623_v23, 0 }
 0x398   :  { %v6700_v61 = vand.u32 4294901760, %v6631_v47 }
 0x39a   :  { %v6701_v18 = vsub.f32 %v6631_v47, %v6700_v61 }
 0x39c   :  { %v6702_v22 = vand.u32 4294901760, %v6701_v18 }
 0x39e   :  { %v6703_v1 = vsub.f32 %v6701_v18, %v6702_v22 }
 0x3a0   :  { %v6704_v5 = vand.u32 4294901760, %v6703_v1 }
 0x3a2   :  { %7563 = vmatmul.mubr.f32.vlgmr.msra.gmra.mrb[22].mxu1 %v6704_v5 }
 0x3a3   :  { %8097 = vmatpush3.bf16.msra.mxu1 %v8096_v15  ;;  %7569 = vmatprep.mubr.msk.f32.mxu1 %vm8285_vm1, %v8283_v3 }
 0x3a4   :  { %8098 = vmatprep.subr.bf16.mxu1 %v8284_v27 }
 0x3aa   :  { %7570 = vmatmul.mubr.f32.vlgmr.msra.gmra.mrb[22].mxu1 %v6700_v61 }
 0x3ab   :  { %8100 = vmatpush3.bf16.msra.mxu1 %v8099_v7  ;;  %7576 = vmatprep.mubr.msk.f32.mxu1 %vm8285_vm1, %v8283_v3 }
 0x3ac   :  { %8101 = vmatprep.subr.bf16.mxu1 %v8284_v27 }
 0x3b2   :  { %7577 = vmatmul.mubr.f32.vlgmr.msra.gmra.mrb[22].mxu1 %v6701_v18 }
 0x3b3   :  { %8103 = vmatpush3.bf16.msra.mxu1 %v8093_v19  ;;  %7583 = vmatprep.mubr.msk.f32.mxu1 %vm8285_vm1, %v8283_v3 }
 0x3b4   :  { %8104 = vmatprep.subr.bf16.mxu1 %v8284_v27 }
 0x3ba   :  { %7584 = vmatmul.mubr.f32.vlgmr.msra.gmra.mrb[22].mxu1 %v6702_v22 }
 0x3bb   :  { %8106 = vmatpush3.bf16.msra.mxu1 %v8105_v39  ;;  %7590 = vmatprep.mubr.msk.f32.mxu1 %vm8285_vm1, %v8283_v3 }
 0x3bc   :  { %8107 = vmatprep.subr.bf16.mxu1 %v8284_v27 }
 0x3c2   :  { %7591 = vmatmul.mubr.f32.vlgmr.msra.gmra.mrb[22].mxu1 %v6700_v61 }
 0x3c3   :  { %8109 = vmatpush3.bf16.msra.mxu1 %v8093_v19  ;;  %7597 = vmatprep.mubr.msk.f32.mxu1 %vm8285_vm1, %v8283_v3 }
 0x3ca   :  { %7598 = vmatmul.mubr.f32.vlgmr.msra.gmra.mrb[22].mxu1 %v6700_v61 }
 0x49d   :  { %v7088_v56 = vpop.f32.mrb[22].mxu1 }
 0x49e   :  { %v8113_v50 = vadd.f32 %v7088_v56, %v6627_v55  ;;  %v7599_v54 = vpop.f32.mrb[23].mxu1 }
 0x4a0   :  { %8281 = vtanh.f32 %v8113_v50 }
 0x4aa   :  { %v8282_v48 = vpop.eup %8281 }
 0x4ab   :  { %7094 = vst.msk [vmem:[%s9950_s10] sm:$0xff] %vm7093_vm3, %v8282_v48 }

</bundles_post_ra>
